<compile_context>
chip_gen: v7x
topology: tpu7x:2x2x1
jax: 0.10.0
libtpu: 0.0.40
codegen_flags: <defaults>
</compile_context>

<pallas_src>
import functools
import math

import jax
import jax.numpy as jnp
from jax import lax
from jax.experimental import pallas as pl
from jax.experimental.pallas import tpu as pltpu


def _round_up(x, m):
    return ((x + m - 1) // m) * m


# --------------------------------------------------------------------------- #
# Kernel
# --------------------------------------------------------------------------- #
def _contrastive_kernel(nvalid_ref, scale_ref, m_ref, t_ref,
                        row_lse_ref, col_lse_ref,
                        row_max_ref, row_sum_ref, *, padded):
    # nvalid_ref  : SMEM (1,) i32   number of valid (unpadded) rows/cols
    # scale_ref   : SMEM (1,) f32   logit_scale_m
    # m_ref       : VMEM (TN, D)    mixture row tile (constant over inner axis)
    # t_ref       : VMEM (TK, D)    track column tile
    # row_lse_ref : VMEM (TN, 1)    per-row log-sum-exp (written at last col step)
    # col_lse_ref : VMEM (1, 8, TK) per-row-tile partial column log-sum-exp
    # row_max_ref : VMEM (TN, 1)    running row max   (online softmax scratch)
    # row_sum_ref : VMEM (TN, 1)    running row sum-exp
    i = pl.program_id(0)          # row tile    ("parallel", megacore-shardable)
    j = pl.program_id(1)          # column tile ("arbitrary", innermost)
    nj = pl.num_programs(1)
    tn, tk = m_ref.shape[0], t_ref.shape[0]

    @pl.when(j == 0)
    def _init():
        row_max_ref[...] = jnp.full(row_max_ref.shape, -jnp.inf, jnp.float32)
        row_sum_ref[...] = jnp.zeros(row_sum_ref.shape, jnp.float32)

    scale = scale_ref[0]

    # (TN, TK) logits tile on the MXU.  Operands stay in their storage dtype
    # (bf16-native full-rate path), f32 accumulation; contraction on the
    # feature dim of both operands (same q @ k.T pattern as the flash-attention
    # reference kernel, no materialized transpose).
    logits = scale * lax.dot_general(
        m_ref[...], t_ref[...],
        dimension_numbers=(((1,), (1,)), ((), ())),
        preferred_element_type=jnp.float32)                     # (TN, TK) f32

    if padded:
        neg = jnp.float32(-1e30)   # finite mask value: exp underflows to 0, no inf-inf
        n_valid = nvalid_ref[0]
        row_ids = i * tn + lax.broadcasted_iota(jnp.int32, (tn, tk), 0)
        col_ids = j * tk + lax.broadcasted_iota(jnp.int32, (tn, tk), 1)
        logits_r = jnp.where(col_ids < n_valid, logits, neg)    # drop padded cols
        logits_c = jnp.where(row_ids < n_valid, logits, neg)    # drop padded rows
    else:
        logits_r = logits
        logits_c = logits

    # ---- row direction (logits_per_mixture CE): online softmax over col tiles
    tile_max = jnp.max(logits_r, axis=1, keepdims=True)         # (TN, 1)
    new_max = jnp.maximum(row_max_ref[...], tile_max)
    corr = jnp.exp(row_max_ref[...] - new_max)
    p_row = jnp.exp(logits_r - new_max)                         # (TN, TK)
    row_sum_ref[...] = corr * row_sum_ref[...] + jnp.sum(p_row, axis=1,
                                                         keepdims=True)
    row_max_ref[...] = new_max

    @pl.when(j == nj - 1)
    def _finalize_rows():
        row_lse_ref[...] = row_max_ref[...] + jnp.log(row_sum_ref[...])

    # ---- column direction (logits_per_track CE): exact over this row tile ----
    # Partial column LSEs per row tile are combined outside the kernel, so the
    # "parallel" row-tile axis never accumulates into shared scratch
    # (megacore-safe on v7x).
    col_max = jnp.max(logits_c, axis=0, keepdims=True)          # (1, TK)
    col_sum = jnp.sum(jnp.exp(logits_c - col_max), axis=0, keepdims=True)
    col_lse = col_max + jnp.log(col_sum)                        # (1, TK)
    # Broadcast over 8 sublanes so the output block keeps (8, 128)-aligned dims.
    col_lse_ref[...] = jnp.broadcast_to(col_lse, (8, tk))[None, :, :]


# --------------------------------------------------------------------------- #
# Tiling / VMEM sizing helpers
# --------------------------------------------------------------------------- #
def _vmem_block_bytes(shape, dtype):
    """Block bytes with (8, 128) sublane/lane padding folded in."""
    s = list(shape)
    s[-1] = _round_up(s[-1], 128)
    if len(s) >= 2:
        s[-2] = _round_up(s[-2], 8)
    return math.prod(s) * jnp.dtype(dtype).itemsize


def _estimate_vmem(tn, tk, d, feat_dtype):
    est = 0
    est += 2 * _vmem_block_bytes((tn, d), feat_dtype)       # mixture tile (2 bufs)
    est += 2 * _vmem_block_bytes((tk, d), feat_dtype)       # track tile   (2 bufs)
    est += 10 * _vmem_block_bytes((tn, tk), jnp.float32)    # live (TN,TK) temporaries
    est += 4 * _vmem_block_bytes((tn, 1), jnp.float32)      # scratch + row_lse blocks
    est += 4 * _vmem_block_bytes((1, 8, tk), jnp.float32)   # col_lse out blocks
    return est


def _pick_tiles(n_pad, d, feat_dtype, vmem_budget):
    # Column tile: lane-dense only; 256 = one pass of the 2x256^2 MXU (v6e/v7x)
    # and two passes of a 128^2 MXU (v5e).  Never below 128.
    tk = 256 if n_pad % 256 == 0 else 128
    # Row tile: as big as the budget allows (track is re-streamed n_pad/TN
    # times, so intensity ~ 2*TN/itemsize flop/byte), capped at 2048 so large
    # batches still expose >= 2 row tiles for v7x megacore.
    tn = max(128, (min(n_pad, 2048) // 128) * 128)
    while tn > 128 and (n_pad % tn != 0
                        or _estimate_vmem(tn, tk, d, feat_dtype) > vmem_budget):
        tn -= 128
    return tn, tk


# --------------------------------------------------------------------------- #
# Wrapper
# --------------------------------------------------------------------------- #
def contrastive_loss(mixture_features, track_features, logit_scale_m, *,
                     block_n=None, block_k=None, matmul_dtype=None):
    """Single-device, unweighted ContrastiveLoss.forward.

    matmul_dtype: optionally cast features (e.g. jnp.bfloat16) before the MXU
    matmul -- full-rate path on v6e/v7x; accumulation stays f32.
    """
    n, d = mixture_features.shape
    assert track_features.shape == (n, d)

    if matmul_dtype is not None:
        cdtype = jnp.dtype(matmul_dtype)
    else:
        cdtype = jnp.result_type(mixture_features.dtype, track_features.dtype)
    mf = mixture_features.astype(cdtype)
    tf = track_features.astype(cdtype)

    # Generation-aware VMEM capacity (v7x has 64 MiB per TensorCore).
    try:
        vmem_cap = int(pltpu.get_tpu_info().vmem_capacity_bytes)
    except Exception:
        vmem_cap = 64 << 20   # conservative (v7x) fallback

    if block_n is None and block_k is None:
        n_pad = _round_up(n, 128)
        budget = min(int(vmem_cap * 0.6), 48 << 20)
        tn, tk = _pick_tiles(n_pad, d, cdtype, budget)
    else:
        tk = block_k if block_k is not None else 128
        tn = block_n if block_n is not None else 128
        assert tn % 128 == 0 and tk % 128 == 0, \
            "tiles must be sublane/lane dense (multiples of 128)"
        n_pad = _round_up(n, math.lcm(tn, tk))

    padded = n_pad != n
    if padded:
        pad = n_pad - n
        mf_p = jnp.pad(mf, ((0, pad), (0, 0)))
        tf_p = jnp.pad(tf, ((0, pad), (0, 0)))
    else:
        mf_p, tf_p = mf, tf

    r_i, r_j = n_pad // tn, n_pad // tk
    scale = jnp.asarray(logit_scale_m, jnp.float32).reshape(1)
    n_valid = jnp.asarray(n, jnp.int32).reshape(1)

    vmem_est = _estimate_vmem(tn, tk, d, cdtype) + (4 << 20)
    vmem_limit = int(min(max(vmem_est, 16 << 20),
                         min(int(vmem_cap * 0.85), 100 << 20)))

    isz = jnp.dtype(cdtype).itemsize
    cost = pl.CostEstimate(
        flops=2 * n_pad * n_pad * d,
        transcendentals=2 * n_pad * n_pad,
        bytes_accessed=(n_pad * d * isz            # mixture: fetched once per row tile
                        + r_i * n_pad * d * isz    # track: re-streamed per row tile
                        + n_pad * 4 + r_i * 8 * n_pad * 4),
    )

    kernel = functools.partial(_contrastive_kernel, padded=padded)

    row_lse, col_lse_part = pl.pallas_call(
        kernel,
        out_shape=(jax.ShapeDtypeStruct((n_pad, 1), jnp.float32),
                   jax.ShapeDtypeStruct((r_i, 8, n_pad), jnp.float32)),
        grid=(r_i, r_j),
        in_specs=[
            pl.BlockSpec(memory_space=pltpu.MemorySpace.SMEM),   # n_valid
            pl.BlockSpec(memory_space=pltpu.MemorySpace.SMEM),   # logit scale
            pl.BlockSpec((tn, d), lambda i, j: (i, 0)),          # mixture row tile
            pl.BlockSpec((tk, d), lambda i, j: (j, 0)),          # track column tile
        ],
        out_specs=(
            pl.BlockSpec((tn, 1), lambda i, j: (i, 0)),          # per-row lse
            pl.BlockSpec((1, 8, tk), lambda i, j: (i, 0, j)),    # partial column lse
        ),
        scratch_shapes=[
            pltpu.VMEM((tn, 1), jnp.float32),                    # running row max
            pltpu.VMEM((tn, 1), jnp.float32),                    # running row sum-exp
        ],
        compiler_params=pltpu.CompilerParams(
            dimension_semantics=("parallel", "arbitrary"),
            vmem_limit_bytes=vmem_limit,
        ),
        cost_estimate=cost,
    )(n_valid, scale, mf_p, tf_p)

    # ---- tiny O(N*D + N*N/TN) epilogue in plain JAX --------------------------
    scale_f = jnp.asarray(logit_scale_m, jnp.float32)
    diag = scale_f * jnp.sum(mf.astype(jnp.float32) * tf.astype(jnp.float32),
                             axis=-1)                                   # (n,)
    lse_row = row_lse[:n, 0]                                            # (n,)
    lse_col = jax.nn.logsumexp(col_lse_part[:, 0, :n], axis=0)          # (n,)
    ce_row = jnp.mean(lse_row - diag)    # CE(logits_per_mixture, arange)
    ce_col = jnp.mean(lse_col - diag)    # CE(logits_per_track,   arange)
    return 0.5 * (ce_row + ce_col)


# --------------------------------------------------------------------------- #
# Pure-JAX reference (mirrors the PyTorch forward)
# --------------------------------------------------------------------------- #
def _reference_loss(mixture, track, scale):
    logits_pm = scale * jnp.dot(mixture, track.T,
                                preferred_element_type=jnp.float32)
    logits_pt = scale * jnp.dot(track, mixture.T,
                                preferred_element_type=jnp.float32)
    labels = jnp.arange(logits_pm.shape[0])

    def ce(logits, labels):
        logp = jax.nn.log_softmax(logits, axis=-1)
        return -jnp.mean(logp[jnp.arange(logits.shape[0]), labels])

    return 0.5 * (ce(logits_pm, labels) + ce(logits_pt, labels))


if __name__ == "__main__":
    key = jax.random.PRNGKey(0)
    k1, k2, k3, k4 = jax.random.split(key, 4)

    # Small CLIP-style shapes.
    N, D = 200, 64                      # N=200 -> padded to 256 inside wrapper
    mixture = jax.random.normal(k1, (N, D), dtype=jnp.float32)
    track = jax.random.normal(k2, (N, D), dtype=jnp.float32)
    mixture = mixture / jnp.linalg.norm(mixture, axis=-1, keepdims=True)
    track = track / jnp.linalg.norm(track, axis=-1, keepdims=True)
    logit_scale_m = jnp.float32(1.0 / 0.07)

    # f32 path, forced 128x128 tiles -> 2x2 grid: exercises the padding masks,
    # the online row softmax and the cross-row-tile column combine.
    loss = jax.block_until_ready(
        contrastive_loss(mixture, track, logit_scale_m, block_n=128, block_k=128))
    ref = _reference_loss(mixture, track, logit_scale_m)
    assert jnp.allclose(loss, ref, rtol=1e-4, atol=1e-4), (loss, ref)

    # bf16 storage path (full-rate MXU), auto-selected tiles, no padding.
    m2 = jax.random.normal(k3, (256, D), dtype=jnp.float32)
    t2 = jax.random.normal(k4, (256, D), dtype=jnp.float32)
    m2 = m2 / jnp.linalg.norm(m2, axis=-1, keepdims=True)
    t2 = t2 / jnp.linalg.norm(t2, axis=-1, keepdims=True)
    m16, t16 = m2.astype(jnp.bfloat16), t2.astype(jnp.bfloat16)
    loss16 = jax.block_until_ready(contrastive_loss(m16, t16, logit_scale_m))
    ref16 = _reference_loss(m16, t16, logit_scale_m)
    assert jnp.allclose(loss16, ref16, rtol=5e-3, atol=5e-3), (loss16, ref16)

    # f32 caller with the reviewer-suggested bf16 matmul cast (v6e/v7x path).
    loss_cast = jax.block_until_ready(
        contrastive_loss(m2, t2, logit_scale_m, matmul_dtype=jnp.bfloat16))
    assert jnp.allclose(loss_cast, ref16, rtol=5e-3, atol=5e-3), (loss_cast, ref16)

    print("KERNEL_OK")
</pallas_src>

<mosaic_0001>
module attributes {stable_mosaic.version = 11 : i64} {
  func.func @_contrastive_kernel(%arg0: i32, %arg1: i32, %arg2: memref<1xi32, #tpu.memory_space<smem>>, %arg3: memref<1xf32, #tpu.memory_space<smem>>, %arg4: memref<128x64xf32, #tpu.memory_space<vmem>>, %arg5: memref<128x64xf32, #tpu.memory_space<vmem>>, %arg6: memref<128x1xf32, #tpu.memory_space<vmem>>, %arg7: memref<1x8x128xf32, #tpu.memory_space<vmem>>, %arg8: memref<128x1xf32, #tpu.memory_space<vmem>>, %arg9: memref<128x1xf32, #tpu.memory_space<vmem>>) attributes {dimension_semantics = [#tpu.dimension_semantics<parallel>, #tpu.dimension_semantics<arbitrary>], iteration_bounds = array<i64: 2, 2>, scalar_prefetch = 0 : i64, scratch_operands = 2 : i64, tpu.core_type = #tpu.core_type<tc>, window_params = [{transform_indices = @transform_0, window_bounds = array<i64: 1>}, {transform_indices = @transform_1, window_bounds = array<i64: 1>}, {transform_indices = @transform_2, window_bounds = array<i64: 128, 64>}, {transform_indices = @transform_3, window_bounds = array<i64: 128, 64>}, {transform_indices = @transform_4, window_bounds = array<i64: 128, 1>}, {transform_indices = @transform_5, window_bounds = array<i64: 1, 8, 128>}]} {
    %c0_i32 = arith.constant 0 : i32
    %0 = arith.cmpi eq, %arg1, %c0_i32 : i32
    %1 = arith.extui %0 : i1 to i32
    %c0_i32_0 = arith.constant 0 : i32
    %2 = arith.cmpi ne, %1, %c0_i32_0 : i32
    scf.if %2 {
      %cst_27 = arith.constant 0xFF800000 : f32
      %59 = vector.broadcast %cst_27 : f32 to vector<128x1xf32>
      %c0_28 = arith.constant 0 : index
      %c0_29 = arith.constant 0 : index
      %60 = vector.load %arg8[%c0_28, %c0_29] : memref<128x1xf32, #tpu.memory_space<vmem>>, vector<128x1xf32>
      tpu.vector_store %arg8[%c0_28, %c0_29], %59 {strides = array<i32>} : memref<128x1xf32, #tpu.memory_space<vmem>>, vector<128x1xf32>,
      %cst_30 = arith.constant 0.000000e+00 : f32
      %61 = vector.broadcast %cst_30 : f32 to vector<128x1xf32>
      %c0_31 = arith.constant 0 : index
      %c0_32 = arith.constant 0 : index
      %62 = vector.load %arg9[%c0_31, %c0_32] : memref<128x1xf32, #tpu.memory_space<vmem>>, vector<128x1xf32>
      tpu.vector_store %arg9[%c0_31, %c0_32], %61 {strides = array<i32>} : memref<128x1xf32, #tpu.memory_space<vmem>>, vector<128x1xf32>,
    } else {
    }
    %c0 = arith.constant 0 : index
    %3 = memref.load %arg3[%c0] : memref<1xf32, #tpu.memory_space<smem>>
    %c0_1 = arith.constant 0 : index
    %c0_2 = arith.constant 0 : index
    %4 = vector.load %arg4[%c0_1, %c0_2] : memref<128x64xf32, #tpu.memory_space<vmem>>, vector<128x64xf32>
    %c0_3 = arith.constant 0 : index
    %c0_4 = arith.constant 0 : index
    %5 = vector.load %arg5[%c0_3, %c0_4] : memref<128x64xf32, #tpu.memory_space<vmem>>, vector<128x64xf32>
    %cst = arith.constant dense<0.000000e+00> : vector<128x128xf32>
    %6 = tpu.matmul %4, %5, %cst {dimension_numbers = #tpu.dot_dimension_numbers<[1], [1], [0], [0], [0, 0, 1, 0], [], []>} : vector<128x64xf32>, vector<128x64xf32>, vector<128x128xf32> -> vector<128x128xf32>
    %7 = vector.broadcast %3 : f32 to vector<128x128xf32>
    %8 = arith.mulf %7, %6 : vector<128x128xf32>
    %c0_5 = arith.constant 0 : index
    %9 = memref.load %arg2[%c0_5] : memref<1xi32, #tpu.memory_space<smem>>
    %c128_i32 = arith.constant 128 : i32
    %10 = arith.muli %arg0, %c128_i32 : i32
    %11 = tpu.iota {dimensions = array<i32: 0>} : vector<128x128xi32>
    %12 = vector.broadcast %10 : i32 to vector<128x128xi32>
    %13 = arith.addi %12, %11 : vector<128x128xi32>
    %c128_i32_6 = arith.constant 128 : i32
    %14 = arith.muli %arg1, %c128_i32_6 : i32
    %15 = tpu.iota {dimensions = array<i32: 1>} : vector<128x128xi32>
    %16 = vector.broadcast %14 : i32 to vector<128x128xi32>
    %17 = arith.addi %16, %15 : vector<128x128xi32>
    %18 = vector.broadcast %9 : i32 to vector<128x128xi32>
    %19 = arith.cmpi slt, %17, %18 : vector<128x128xi32>
    %cst_7 = arith.constant -1.000000e+30 : f32
    %20 = vector.broadcast %cst_7 : f32 to vector<128x128xf32>
    %21 = arith.select %19, %8, %20 : vector<128x128xi1>, vector<128x128xf32>
    %22 = vector.broadcast %9 : i32 to vector<128x128xi32>
    %23 = arith.cmpi slt, %13, %22 : vector<128x128xi32>
    %cst_8 = arith.constant -1.000000e+30 : f32
    %24 = vector.broadcast %cst_8 : f32 to vector<128x128xf32>
    %25 = arith.select %23, %8, %24 : vector<128x128xi1>, vector<128x128xf32>
    %cst_9 = arith.constant dense<0xFF800000> : vector<128xf32>
    %26 = vector.multi_reduction <maximumf>, %21, %cst_9 [1] : vector<128x128xf32> to vector<128xf32>
    %27 = vector.shape_cast %26 : vector<128xf32> to vector<128x1xf32>
    %c0_10 = arith.constant 0 : index
    %c0_11 = arith.constant 0 : index
    %28 = vector.load %arg8[%c0_10, %c0_11] : memref<128x1xf32, #tpu.memory_space<vmem>>, vector<128x1xf32>
    %29 = arith.maximumf %28, %27 : vector<128x1xf32>
    %c0_12 = arith.constant 0 : index
    %c0_13 = arith.constant 0 : index
    %30 = vector.load %arg8[%c0_12, %c0_13] : memref<128x1xf32, #tpu.memory_space<vmem>>, vector<128x1xf32>
    %31 = arith.subf %30, %29 : vector<128x1xf32>
    %32 = math.exp %31 : vector<128x1xf32>
    %33 = vector.broadcast %29 : vector<128x1xf32> to vector<128x128xf32>
    %34 = arith.subf %21, %33 : vector<128x128xf32>
    %35 = math.exp %34 : vector<128x128xf32>
    %c0_14 = arith.constant 0 : index
    %c0_15 = arith.constant 0 : index
    %36 = vector.load %arg9[%c0_14, %c0_15] : memref<128x1xf32, #tpu.memory_space<vmem>>, vector<128x1xf32>
    %37 = arith.mulf %32, %36 : vector<128x1xf32>
    %cst_16 = arith.constant dense<0.000000e+00> : vector<128xf32>
    %38 = vector.multi_reduction <add>, %35, %cst_16 [1] : vector<128x128xf32> to vector<128xf32>
    %39 = vector.shape_cast %38 : vector<128xf32> to vector<128x1xf32>
    %40 = arith.addf %37, %39 : vector<128x1xf32>
    %c0_17 = arith.constant 0 : index
    %c0_18 = arith.constant 0 : index
    %41 = vector.load %arg9[%c0_17, %c0_18] : memref<128x1xf32, #tpu.memory_space<vmem>>, vector<128x1xf32>
    tpu.vector_store %arg9[%c0_17, %c0_18], %40 {strides = array<i32>} : memref<128x1xf32, #tpu.memory_space<vmem>>, vector<128x1xf32>,
    %c0_19 = arith.constant 0 : index
    %c0_20 = arith.constant 0 : index
    %42 = vector.load %arg8[%c0_19, %c0_20] : memref<128x1xf32, #tpu.memory_space<vmem>>, vector<128x1xf32>
    tpu.vector_store %arg8[%c0_19, %c0_20], %29 {strides = array<i32>} : memref<128x1xf32, #tpu.memory_space<vmem>>, vector<128x1xf32>,
    %c1_i32 = arith.constant 1 : i32
    %43 = arith.cmpi eq, %arg1, %c1_i32 : i32
    %44 = arith.extui %43 : i1 to i32
    %c0_i32_21 = arith.constant 0 : i32
    %45 = arith.cmpi ne, %44, %c0_i32_21 : i32
    scf.if %45 {
      %c0_27 = arith.constant 0 : index
      %c0_28 = arith.constant 0 : index
      %59 = vector.load %arg8[%c0_27, %c0_28] : memref<128x1xf32, #tpu.memory_space<vmem>>, vector<128x1xf32>
      %c0_29 = arith.constant 0 : index
      %c0_30 = arith.constant 0 : index
      %60 = vector.load %arg9[%c0_29, %c0_30] : memref<128x1xf32, #tpu.memory_space<vmem>>, vector<128x1xf32>
      %61 = math.log %60 : vector<128x1xf32>
      %62 = arith.addf %59, %61 : vector<128x1xf32>
      %c0_31 = arith.constant 0 : index
      %c0_32 = arith.constant 0 : index
      %63 = vector.load %arg6[%c0_31, %c0_32] : memref<128x1xf32, #tpu.memory_space<vmem>>, vector<128x1xf32>
      tpu.vector_store %arg6[%c0_31, %c0_32], %62 {strides = array<i32>} : memref<128x1xf32, #tpu.memory_space<vmem>>, vector<128x1xf32>,
    } else {
    }
    %cst_22 = arith.constant dense<0xFF800000> : vector<128xf32>
    %46 = vector.multi_reduction <maximumf>, %25, %cst_22 [0] : vector<128x128xf32> to vector<128xf32>
    %47 = vector.shape_cast %46 : vector<128xf32> to vector<1x128xf32>
    %48 = vector.broadcast %47 : vector<1x128xf32> to vector<128x128xf32>
    %49 = arith.subf %25, %48 : vector<128x128xf32>
    %50 = math.exp %49 : vector<128x128xf32>
    %cst_23 = arith.constant dense<0.000000e+00> : vector<128xf32>
    %51 = vector.multi_reduction <add>, %50, %cst_23 [0] : vector<128x128xf32> to vector<128xf32>
    %52 = vector.shape_cast %51 : vector<128xf32> to vector<1x128xf32>
    %53 = math.log %52 : vector<1x128xf32>
    %54 = arith.addf %47, %53 : vector<1x128xf32>
    %55 = vector.shape_cast %54 : vector<1x128xf32> to vector<1x128xf32>
    %56 = vector.broadcast %55 : vector<1x128xf32> to vector<8x128xf32>
    %57 = vector.shape_cast %56 : vector<8x128xf32> to vector<1x8x128xf32>
    %c0_24 = arith.constant 0 : index
    %c0_25 = arith.constant 0 : index
    %c0_26 = arith.constant 0 : index
    %58 = vector.load %arg7[%c0_24, %c0_25, %c0_26] : memref<1x8x128xf32, #tpu.memory_space<vmem>>, vector<1x8x128xf32>
    tpu.vector_store %arg7[%c0_24, %c0_25, %c0_26], %57 {strides = array<i32>} : memref<1x8x128xf32, #tpu.memory_space<vmem>>, vector<1x8x128xf32>,
    return
  }
  func.func @transform_0(%arg0: i32, %arg1: i32) -> i32 {
    %c0_i32 = arith.constant 0 : i32
    %c0_i32_0 = arith.constant 0 : i32
    return %c0_i32 : i32
  }
  func.func @transform_1(%arg0: i32, %arg1: i32) -> i32 {
    %c0_i32 = arith.constant 0 : i32
    %c0_i32_0 = arith.constant 0 : i32
    return %c0_i32 : i32
  }
  func.func @transform_2(%arg0: i32, %arg1: i32) -> (i32, i32) {
    %c0_i32 = arith.constant 0 : i32
    %c0_i32_0 = arith.constant 0 : i32
    return %arg0, %c0_i32 : i32, i32
  }
  func.func @transform_3(%arg0: i32, %arg1: i32) -> (i32, i32) {
    %c0_i32 = arith.constant 0 : i32
    %c0_i32_0 = arith.constant 0 : i32
    return %arg1, %c0_i32 : i32, i32
  }
  func.func @transform_4(%arg0: i32, %arg1: i32) -> (i32, i32) {
    %c0_i32 = arith.constant 0 : i32
    %c0_i32_0 = arith.constant 0 : i32
    return %arg0, %c0_i32 : i32, i32
  }
  func.func @transform_5(%arg0: i32, %arg1: i32) -> (i32, i32, i32) {
    %c0_i32 = arith.constant 0 : i32
    %c0_i32_0 = arith.constant 0 : i32
    return %arg0, %c0_i32, %arg1 : i32, i32, i32
  }
}

</mosaic_0001>

<bundles_post_ra>
// kernel: tpu_custom_call.1
= control target key start
LH: loop header
LB: loop body
LE: loop exit
PB: predicated region body
PF: predicated region fallthrough
CT: control target
= control target key end

     0   :  { %s2783_s0 = inlined_call_operand.<no memory space> [shape: s32[1], index: 0, kind: input, shape index: {}]   ;;  %s2784_s1 = inlined_call_operand.<no memory space> [shape: f32[1], index: 1, kind: input, shape index: {}]   ;;  %s2785_s2 = inlined_call_operand.vmem [shape: f32[256,64], index: 2, kind: input, shape index: {}]   ;;  %s2786_s3 = inlined_call_operand.vmem [shape: f32[256,64], index: 3, kind: input, shape index: {}]   ;;  %s2787_s4 = inlined_call_operand.vmem [shape: f32[256,1], index: 4, kind: output, shape index: {0}]   ;;  %s2788_s5 = inlined_call_operand.hbm [shape: f32[2,8,256], index: 5, kind: output, shape index: {1}]  }
   0x1   :  { %11 = sst [smem:[#allocation4]] %s2783_s0 }
   0x2   :  { %12 = sst [smem:[#allocation5]] %s2784_s1 }
   0x3   :  { %13 = vsyncpa [#allocation7], 0 }
   0x4   :  { %15 = vsyncpa [#allocation7 + $0x1], 0  ;;  %s1925_s22 = smov 0   ;;  %s1927_s23 = smov 0  }
   0x5   :  { %s1929_s24 = smov 0   ;;  %s1931_s25 = smov 0  }
   0x6   :  { %s1933_s26 = smov 0   ;;  %s1935_s27 = smov 0  }
   0x7   :  { %s1937_s28 = smov 0   ;;  %s1939_s0 = smov 0  }
   0x8 LB: > { %s1378_s1 = sadd.s32 4294967295, %s1883_s0   ;;  %s1379_s29 = sadd.s32 4294967294, %s1883_s0   ;;  %s1883_s0 = sphi %s1939_s0, %s21_s0   ;;  %s1879_s28 = sphi %s1937_s28, %s2865_s28   ;;  %s1875_s27 = sphi %s1935_s27, %s2864_s27   ;;  %s1871_s26 = sphi %s1933_s26, %s2863_s26   ;;  %s1867_s25 = sphi %s1931_s25, %s2862_s25   ;;  %s1863_s24 = sphi %s1929_s24, %s2861_s24   ;;  %s1859_s23 = sphi %s1927_s23, %s2860_s23   ;;  %s1855_s22 = sphi %s1925_s22, %s2859_s22  }
   0x9   : > { %s30_s30 = sadd.s32 1, %s1875_s27  ;;  %s33_s6 = sadd.s32 1, %s1879_s28 }
   0xa   : > { %p31_p0 = scmp.ge.s32.totalorder %s30_s30, 2  ;;  %p172_p1 = scmp.ne.s32.totalorder %s1863_s24, %s1859_s23 }
   0xb   : > { %p173_p2 = scmp.eq.s32.totalorder %s1378_s1, 3  ;;  %p178_p5 = scmp.ne.s32.totalorder %s1859_s23, %s1855_s22 }
   0xc   : > { %s2867_s30 = smov (%p31_p0, %s30_s30), 0  ;;  %s2869_s6 = smov (!%p31_p0, %s33_s6), %s1879_s28 }
   0xd   : > { %s158_s7 = ssub.s32 %s1875_s27, %s2867_s30  ;;  %p1976_p3 = por %p173_p2, %p172_p1 }
   0xe   : > { %p35_p4 = scmp.ge.s32.totalorder %s2869_s6, 2  ;;  %p179_p6 = scmp.eq.s32.totalorder %s1379_s29, 3 }
   0xf   : > { %p1382_p7 = scmp.ge.s32.totalorder %s1883_s0, 1  ;;  %p221_p9 = scmp.lt.s32.totalorder %s1883_s0, 5 }
  0x10   : > { %s2871_s6 = smov (%p35_p4, %s2869_s6), 0  ;;  %p1985_p8 = por %p179_p6, %p178_p5 }
  0x11   : > { %2806 = sst [smem:[#allocation9_spill]] %s2871_s6  ;;  %s157_s10 = ssub.s32 %s1879_s28, %s2871_s6 }
  0x12   : > { %s162_s11 = sadd.s32 1, %s1863_s24  ;;  %s159_s12 = sor.u32 %s158_s7, %s157_s10 }
  0x13   : > { %p222_p10 = pnand %p1382_p7, %p221_p9  ;;  %p160_p11 = scmp.eq.s32.totalorder %s159_s12, 0 }
  0x15   : > { %s1994_s13 = scalar_select %p160_p11, %s1863_s24, %s162_s11  }
  0x16   : > { %225 = sbr.rel (%p222_p10) target bundleno = 951 (0x3b7), region = 36 }
  0x1d   : > { %s2789_s14 = sand.u32 1, %s1859_s23   ;;  %s1384_s15 = sshll.u32 %s1871_s26, 4 }
  0x1e   : > { %s2000_s16 = sshll.u32 %s2789_s14, 3  ;;  %p260_p12 = scmp.lt.s32.totalorder %s1384_s15, 31 }
  0x1f   : > { %s1386_s17 = sshll.u32 %s1867_s25, 4  ;;  %s258_s6 = scalar_lea.vmem [#allocation6], %s2000_s16 }
  0x20   : > { %s2873_s15 = smov (!%p260_p12, %s1384_s15), 31  ;;  %p266_p13 = scmp.lt.s32.totalorder %s1386_s17, 31 }
  0x21   : > { %s1385_s18 = sshll.u32 %s2873_s15, 3  ;;  %p1390_p0 = scmp.ne.s32.totalorder %s1867_s25, 0 }
  0x22   : > { %s2006_s21 = scalar_lea.vmem %s2785_s2, %s1385_s18  ;;  %s2011_s7 = scalar_lea.vmem %s2787_s4, %s1385_s18  ;;  %vm281_vm0 = vcmask (!%p1390_p0), 7168   ;;  %v1885_v0 = vmov (!%p1390_p0), -inf   ;;  %v1886_v1 = vmov (!%p1390_p0), 0.0  }
  0x23   : > { %s2875_s17 = smov (!%p266_p13, %s1386_s17), 31  ;;  %280 = sbr.rel (%p1390_p0) target bundleno = 52 (0x34), region = 40 }
  0x24   : > { %s1387_s10 = sshll.u32 %s2875_s17, 3  ;;  %282 = vst.msk [vmem:[#allocation2] sm:$0xff] (!%p1390_p0), %vm281_vm0, %v1885_v0  ;;  %283 = vst.msk [vmem:[#allocation2 + $0x8] sm:$0xff] (!%p1390_p0), %vm281_vm0, %v1885_v0 }
  0x25   : > { %s2016_s14 = scalar_lea.vmem %s2786_s3, %s1387_s10  ;;  %284 = vst.msk [vmem:[#allocation2 + $0x10] sm:$0xff] (!%p1390_p0), %vm281_vm0, %v1885_v0  ;;  %285 = vst.msk [vmem:[#allocation2 + $0x18] sm:$0xff] (!%p1390_p0), %vm281_vm0, %v1885_v0 }
  0x26   : > { %286 = vst.msk [vmem:[#allocation2 + $0x20] sm:$0xff] (!%p1390_p0), %vm281_vm0, %v1885_v0  ;;  %287 = vst.msk [vmem:[#allocation2 + $0x28] sm:$0xff] (!%p1390_p0), %vm281_vm0, %v1885_v0 }
  0x27   : > { %288 = vst.msk [vmem:[#allocation2 + $0x30] sm:$0xff] (!%p1390_p0), %vm281_vm0, %v1885_v0  ;;  %289 = vst.msk [vmem:[#allocation2 + $0x38] sm:$0xff] (!%p1390_p0), %vm281_vm0, %v1885_v0 }
  0x28   : > { %290 = vst.msk [vmem:[#allocation2 + $0x40] sm:$0xff] (!%p1390_p0), %vm281_vm0, %v1885_v0  ;;  %291 = vst.msk [vmem:[#allocation2 + $0x48] sm:$0xff] (!%p1390_p0), %vm281_vm0, %v1885_v0 }
  0x29   : > { %292 = vst.msk [vmem:[#allocation2 + $0x50] sm:$0xff] (!%p1390_p0), %vm281_vm0, %v1885_v0  ;;  %293 = vst.msk [vmem:[#allocation2 + $0x58] sm:$0xff] (!%p1390_p0), %vm281_vm0, %v1885_v0 }
  0x2a   : > { %294 = vst.msk [vmem:[#allocation2 + $0x60] sm:$0xff] %vm281_vm0, %v1885_v0  ;;  %295 = vst.msk [vmem:[#allocation2 + $0x68] sm:$0xff] %vm281_vm0, %v1885_v0 }
  0x2b   : > { %296 = vst.msk [vmem:[#allocation2 + $0x70] sm:$0xff] %vm281_vm0, %v1885_v0  ;;  %297 = vst.msk [vmem:[#allocation2 + $0x78] sm:$0xff] %vm281_vm0, %v1885_v0 }
  0x2c   : > { %298 = vst.msk [vmem:[#allocation3] sm:$0xff] %vm281_vm0, %v1886_v1  ;;  %299 = vst.msk [vmem:[#allocation3 + $0x8] sm:$0xff] %vm281_vm0, %v1886_v1 }
  0x2d   : > { %300 = vst.msk [vmem:[#allocation3 + $0x10] sm:$0xff] %vm281_vm0, %v1886_v1  ;;  %301 = vst.msk [vmem:[#allocation3 + $0x18] sm:$0xff] %vm281_vm0, %v1886_v1 }
  0x2e   : > { %302 = vst.msk [vmem:[#allocation3 + $0x20] sm:$0xff] %vm281_vm0, %v1886_v1  ;;  %303 = vst.msk [vmem:[#allocation3 + $0x28] sm:$0xff] %vm281_vm0, %v1886_v1 }
  0x2f   : > { %304 = vst.msk [vmem:[#allocation3 + $0x30] sm:$0xff] %vm281_vm0, %v1886_v1  ;;  %305 = vst.msk [vmem:[#allocation3 + $0x38] sm:$0xff] %vm281_vm0, %v1886_v1 }
  0x30   : > { %306 = vst.msk [vmem:[#allocation3 + $0x40] sm:$0xff] %vm281_vm0, %v1886_v1  ;;  %307 = vst.msk [vmem:[#allocation3 + $0x48] sm:$0xff] %vm281_vm0, %v1886_v1 }
  0x31   : > { %308 = vst.msk [vmem:[#allocation3 + $0x50] sm:$0xff] %vm281_vm0, %v1886_v1  ;;  %309 = vst.msk [vmem:[#allocation3 + $0x58] sm:$0xff] %vm281_vm0, %v1886_v1 }
  0x32   : > { %310 = vst.msk [vmem:[#allocation3 + $0x60] sm:$0xff] %vm281_vm0, %v1886_v1  ;;  %311 = vst.msk [vmem:[#allocation3 + $0x68] sm:$0xff] %vm281_vm0, %v1886_v1 }
  0x33   : > { %312 = vst.msk [vmem:[#allocation3 + $0x70] sm:$0xff] %vm281_vm0, %v1886_v1  ;;  %313 = vst.msk [vmem:[#allocation3 + $0x78] sm:$0xff] %vm281_vm0, %v1886_v1 }
  0x34 PF: > { %v331_v2 = vld [vmem:[%s2016_s14] sm:$0xff]  ;;  %v332_v3 = vld [vmem:[%s2016_s14 + $0x8] sm:$0xff]  ;;  %vm347_vm1 = vcmask 523264   ;;  %v333_v4 = vld [vmem:[%s2016_s14 + $0x10] sm:$0xff]  ;;  %v608_v43 = vlaneseq  ;;  %s1423_s15 = sshll.u32 %s1871_s26, 7  ;;  %s314_s17 = sld [smem:[#allocation5]] }
  0x35   : > { %v1519_v5 = vpack.c.bf16 %v332_v3, %v331_v2  ;;  %vm2057_vm2 = vmpackc.low %vm347_vm1, %vm347_vm1  ;;  %v334_v7 = vld [vmem:[%s2016_s14 + $0x18] sm:$0xff]  ;;  %v315_v9 = vld [vmem:[%s2006_s21] sm:$0xff]  ;;  %v625_v46 = vstv %s1423_s15  ;;  %s1424_s18 = sshll.u32 %s1867_s25, 7  ;;  %p1425_p1 = scmp.ne.s32.totalorder %s1867_s25, 1 }
  0x36   : > { %v1525_v8 = vpack.c.bf16 %v334_v7, %v333_v4  ;;  %v335_v10 = vld [vmem:[%s2016_s14 + $0x20] sm:$0xff]  ;;  %v336_v11 = vld [vmem:[%s2016_s14 + $0x28] sm:$0xff]  ;;  %1495 = vmatprep.mubr.msk.f32.mxu0 %vm347_vm1, %v315_v9  ;;  %v337_v14 = vld [vmem:[%s2016_s14 + $0x30] sm:$0xff]  ;;  %v609_v44 = vshrl.u32 %v608_v43, 7 }
  0x37   : > { %1521 = vmatprep.subr.msk.bf16.mxu0 %vm2057_vm2, %v1519_v5  ;;  %1567 = vmatprep.subr.msk.bf16.mxu1 %vm2057_vm2, %v1519_v5  ;;  %v323_v12 = vld [vmem:[%s2006_s21 + $0x40] sm:$0xff]  ;;  %v1531_v13 = vpack.c.bf16 %v336_v11, %v335_v10  ;;  %v338_v15 = vld [vmem:[%s2016_s14 + $0x38] sm:$0xff]  ;;  %v340_v18 = vld [vmem:[%s2016_s14 + $0x48] sm:$0xff] }
  0x38   : > { %1524 = vmatpush3.bf16.xpose.msk.msra.mxu0 %vm2057_vm2, %v1519_v5  ;;  %1575 = vmatpush3.bf16.xpose.msk.msra.mxu1 %vm2057_vm2, %v1519_v5  ;;  %v1537_v16 = vpack.c.bf16 %v338_v15, %v337_v14  ;;  %v339_v17 = vld [vmem:[%s2016_s14 + $0x40] sm:$0xff]  ;;  %v341_v20 = vld [vmem:[%s2016_s14 + $0x50] sm:$0xff]  ;;  %v342_v21 = vld [vmem:[%s2016_s14 + $0x58] sm:$0xff]  ;;  %v610_v45 = vadd.s32 8, %v609_v44  ;;  %v2175_v49 = vadd.s32 %v625_v46, %v609_v44  ;;  %v618_v50 = vadd.s32 72, %v609_v44 }
  0x39   : > { %1527 = vmatprep.subr.msk.bf16.mxu0 %vm2057_vm2, %v1525_v8  ;;  %1568 = vmatprep.subr.msk.bf16.mxu1 %vm2057_vm2, %v1525_v8  ;;  %v1543_v19 = vpack.c.bf16 %v340_v18, %v339_v17  ;;  %v1549_v22 = vpack.c.bf16 %v342_v21, %v341_v20  ;;  %v343_v23 = vld [vmem:[%s2016_s14 + $0x60] sm:$0xff]  ;;  %v344_v24 = vld [vmem:[%s2016_s14 + $0x68] sm:$0xff]  ;;  %v345_v26 = vld [vmem:[%s2016_s14 + $0x70] sm:$0xff]  ;;  %v617_v51 = vadd.s32 64, %v609_v44  ;;  %v612_v54 = vadd.s32 24, %v609_v44 }
  0x3a   : > { %1507 = vmatprep.mubr.msk.f32.mxu1 %vm347_vm1, %v323_v12  ;;  %v1555_v25 = vpack.c.bf16 %v344_v24, %v343_v23  ;;  %v346_v27 = vld [vmem:[%s2016_s14 + $0x78] sm:$0xff]  ;;  %v316_v29 = vld [vmem:[%s2006_s21 + $0x8] sm:$0xff]  ;;  %v317_v31 = vld [vmem:[%s2006_s21 + $0x10] sm:$0xff]  ;;  %s606_s14 = sld [smem:[#allocation4]]  ;;  %v2171_v47 = vadd.s32 %v625_v46, %v610_v45  ;;  %v635_v52 = vadd.s32 %v625_v46, %v618_v50  ;;  %v611_v56 = vadd.s32 16, %v609_v44 }
  0x3b   : > { %v1561_v28 = vpack.c.bf16 %v346_v27, %v345_v26  ;;  %v324_v30 = vld [vmem:[%s2006_s21 + $0x48] sm:$0xff]  ;;  %v325_v32 = vld [vmem:[%s2006_s21 + $0x50] sm:$0xff]  ;;  %v318_v33 = vld [vmem:[%s2006_s21 + $0x18] sm:$0xff]  ;;  %v634_v53 = vadd.s32 %v625_v46, %v617_v51  ;;  %v2183_v55 = vadd.s32 %v625_v46, %v612_v54  ;;  %v620_v57 = vadd.s32 88, %v609_v44 }
  0x3c   : > { %v326_v34 = vld [vmem:[%s2006_s21 + $0x58] sm:$0xff]  ;;  %v319_v35 = vld [vmem:[%s2006_s21 + $0x20] sm:$0xff]  ;;  %v320_v37 = vld [vmem:[%s2006_s21 + $0x28] sm:$0xff]  ;;  %v2187_v58 = vadd.s32 %v625_v46, %v611_v56  ;;  %v619_v60 = vadd.s32 80, %v609_v44  ;;  %v614_v62 = vadd.s32 40, %v609_v44  ;;  %v622_v0 = vadd.s32 104, %v609_v44 }
  0x3d   : > { %v327_v36 = vld [vmem:[%s2006_s21 + $0x60] sm:$0xff]  ;;  %v328_v38 = vld [vmem:[%s2006_s21 + $0x68] sm:$0xff]  ;;  %v321_v39 = vld [vmem:[%s2006_s21 + $0x30] sm:$0xff]  ;;  %v2189_v59 = vadd.s32 %v625_v46, %v620_v57  ;;  %v613_v2 = vadd.s32 32, %v609_v44  ;;  %v616_v3 = vadd.s32 56, %v609_v44  ;;  %v621_v6 = vadd.s32 96, %v609_v44 }
  0x3e   : > { %v329_v40 = vld [vmem:[%s2006_s21 + $0x70] sm:$0xff]  ;;  %v322_v41 = vld [vmem:[%s2006_s21 + $0x38] sm:$0xff]  ;;  %v2195_v61 = vadd.s32 %v625_v46, %v619_v60  ;;  %v2199_v63 = vadd.s32 %v625_v46, %v614_v62  ;;  %v2203_v1 = vadd.s32 %v625_v46, %v622_v0  ;;  %v624_v7 = vadd.s32 120, %v609_v44 }
  0x3f   : > { %v330_v42 = vld [vmem:[%s2006_s21 + $0x78] sm:$0xff]  ;;  %v2207_v4 = vadd.s32 %v625_v46, %v613_v2  ;;  %v2209_v5 = vadd.s32 %v625_v46, %v616_v3  ;;  %v615_v10 = vadd.s32 48, %v609_v44  ;;  %v623_v11 = vadd.s32 112, %v609_v44 }
  0x40   : > { %1530 = vmatpush3.bf16.xpose.msk.msra.mxu0 %vm2057_vm2, %v1525_v8  ;;  %1576 = vmatpush3.bf16.xpose.msk.msra.mxu1 %vm2057_vm2, %v1525_v8  ;;  %v2173_v48 = vstv %s606_s14  ;;  %v2215_v8 = vadd.s32 %v625_v46, %v621_v6  ;;  %v2217_v9 = vadd.s32 %v625_v46, %v624_v7  ;;  %v644_v14 = vand.u32 127, %v608_v43 }
  0x41   : > { %1533 = vmatprep.subr.msk.bf16.mxu0 %vm2057_vm2, %v1531_v13  ;;  %1569 = vmatprep.subr.msk.bf16.mxu1 %vm2057_vm2, %v1531_v13  ;;  %vm666_vm3 = vcmp.lt.s32.totalorder %v2171_v47, %v2173_v48  ;;  %vm665_vm4 = vcmp.lt.s32.totalorder %v2175_v49, %v2173_v48  ;;  %vm674_vm5 = vcmp.lt.s32.totalorder %v635_v52, %v2173_v48  ;;  %v645_v15 = vstv %s1424_s18 }
  0x42   : > { %vm673_vm6 = vcmp.lt.s32.totalorder %v634_v53, %v2173_v48  ;;  %vm668_vm7 = vcmp.lt.s32.totalorder %v2183_v55, %v2173_v48  ;;  %vm667_vm8 = vcmp.lt.s32.totalorder %v2187_v58, %v2173_v48  ;;  %vm676_vm9 = vcmp.lt.s32.totalorder %v2189_v59, %v2173_v48 }
  0x43   : > { %vm675_vm10 = vcmp.lt.s32.totalorder %v2195_v61, %v2173_v48  ;;  %vm670_vm11 = vcmp.lt.s32.totalorder %v2199_v63, %v2173_v48  ;;  %vm678_vm12 = vcmp.lt.s32.totalorder %v2203_v1, %v2173_v48  ;;  %vm669_vm13 = vcmp.lt.s32.totalorder %v2207_v4, %v2173_v48 }
  0x44   : > { %vm672_vm14 = vcmp.lt.s32.totalorder %v2209_v5, %v2173_v48  ;;  %vm677_vm15 = vcmp.lt.s32.totalorder %v2215_v8, %v2173_v48  ;;  %v2223_v12 = vadd.s32 %v625_v46, %v615_v10  ;;  %v589_v17 = vstv %s314_s17 }
  0x48   : > { %1536 = vmatpush3.bf16.xpose.msk.msra.mxu0 %vm2057_vm2, %v1531_v13  ;;  %1577 = vmatpush3.bf16.xpose.msk.msra.mxu1 %vm2057_vm2, %v1531_v13  ;;  %v2225_v13 = vadd.s32 %v625_v46, %v623_v11 }
  0x49   : > { %1539 = vmatprep.subr.msk.bf16.mxu0 %vm2057_vm2, %v1537_v16  ;;  %1570 = vmatprep.subr.msk.bf16.mxu1 %vm2057_vm2, %v1537_v16 }
  0x50   : > { %1542 = vmatpush3.bf16.xpose.msk.msra.mxu0 %vm2057_vm2, %v1537_v16  ;;  %1578 = vmatpush3.bf16.xpose.msk.msra.mxu1 %vm2057_vm2, %v1537_v16  ;;  %v646_v16 = vadd.s32 %v645_v15, %v644_v14 }
  0x51   : > { %1545 = vmatprep.subr.msk.bf16.mxu0 %vm2057_vm2, %v1543_v19  ;;  %1571 = vmatprep.subr.msk.bf16.mxu1 %vm2057_vm2, %v1543_v19 }
  0x52   : > { %vm2233_vm0 = vcmp.lt.s32.totalorder %v646_v16, %v2173_v48 }
  0x58   : > { %1548 = vmatpush3.bf16.xpose.msk.msra.mxu0 %vm2057_vm2, %v1543_v19  ;;  %1579 = vmatpush3.bf16.xpose.msk.msra.mxu1 %vm2057_vm2, %v1543_v19 }
  0x59   : > { %1551 = vmatprep.subr.msk.bf16.mxu0 %vm2057_vm2, %v1549_v22  ;;  %1572 = vmatprep.subr.msk.bf16.mxu1 %vm2057_vm2, %v1549_v22 }
  0x60   : > { %1554 = vmatpush3.bf16.xpose.msk.msra.mxu0 %vm2057_vm2, %v1549_v22  ;;  %1580 = vmatpush3.bf16.xpose.msk.msra.mxu1 %vm2057_vm2, %v1549_v22 }
  0x61   : > { %1557 = vmatprep.subr.msk.bf16.mxu0 %vm2057_vm2, %v1555_v25  ;;  %1573 = vmatprep.subr.msk.bf16.mxu1 %vm2057_vm2, %v1555_v25 }
  0x68   : > { %1560 = vmatpush3.bf16.xpose.msk.msra.mxu0 %vm2057_vm2, %v1555_v25  ;;  %1581 = vmatpush3.bf16.xpose.msk.msra.mxu1 %vm2057_vm2, %v1555_v25 }
  0x69   : > { %1563 = vmatprep.subr.msk.bf16.mxu0 %vm2057_vm2, %v1561_v28  ;;  %1574 = vmatprep.subr.msk.bf16.mxu1 %vm2057_vm2, %v1561_v28 }
  0x70   : > { %1566 = vmatpush3.bf16.xpose.msk.msra.mxu0 %vm2057_vm2, %v1561_v28  ;;  %1582 = vmatpush3.bf16.xpose.msk.msra.mxu1 %vm2057_vm2, %v1561_v28  ;;  %vm679_vm2 = vcmp.lt.s32.totalorder %v2225_v13, %v2173_v48 }
  0x77   : > { %1496 = vmatmul.mubr.msk.f32.vlgmr.msra.gmra.mrb[0].mxu0 %vm347_vm1, %v316_v29  ;;  %1508 = vmatmul.mubr.msk.f32.vlgmr.msra.gmra.mrb[0].mxu1 %vm347_vm1, %v324_v30 }
  0x78   : > { %1498 = vmatprep.mubr.msk.f32.mxu0 %vm347_vm1, %v317_v31  ;;  %1510 = vmatprep.mubr.msk.f32.mxu1 %vm347_vm1, %v325_v32 }
  0x7b   : > { %1499 = vmatmul.mubr.msk.f32.gmra.mrb[2].mxu0 %vm347_vm1, %v318_v33  ;;  %1511 = vmatmul.mubr.msk.f32.gmra.mrb[2].mxu1 %vm347_vm1, %v326_v34 }
  0x7c   : > { %1501 = vmatprep.mubr.msk.f32.mxu0 %vm347_vm1, %v319_v35  ;;  %1513 = vmatprep.mubr.msk.f32.mxu1 %vm347_vm1, %v327_v36 }
  0x7f   : > { %1502 = vmatmul.mubr.msk.f32.gmra.mrb[4].mxu0 %vm347_vm1, %v320_v37  ;;  %1514 = vmatmul.mubr.msk.f32.gmra.mrb[4].mxu1 %vm347_vm1, %v328_v38 }
  0x80   : > { %1504 = vmatprep.mubr.msk.f32.mxu0 %vm347_vm1, %v321_v39  ;;  %1516 = vmatprep.mubr.msk.f32.mxu1 %vm347_vm1, %v329_v40 }
  0x83   : > { %1505 = vmatmul.mubr.msk.f32.gmra.mrb[6].mxu0 %vm347_vm1, %v322_v41  ;;  %1517 = vmatmul.mubr.msk.f32.gmra.mrb[6].mxu1 %vm347_vm1, %v330_v42  ;;  %vm671_vm1 = vcmp.lt.s32.totalorder %v2223_v12, %v2173_v48  ;;  %v1887_v12 = vmov 0  }
  0x84   : > { %1658 = vset.pattern.permute.xlu0 %v1887_v12  ;;  %1657 = vset.pattern.permute.xlu1 %v1887_v12 }
 0x14a   : > { %v1497_v18 = vpop.f32.mrb[0].mxu0  ;;  %v1509_v19 = vpop.f32.mrb[0].mxu1 }
 0x14b   : > { %v591_v21 = vmul.f32 %v1497_v18, %v589_v17  ;;  %v599_v22 = vmul.f32 %v1509_v19, %v589_v17  ;;  %v510_v23 = vpop.f32.mrb[1].mxu0  ;;  %v550_v24 = vpop.f32.mrb[1].mxu1 }
 0x14c   : > { %v590_v25 = vmul.f32 %v589_v17, %v510_v23  ;;  %v598_v26 = vmul.f32 %v589_v17, %v550_v24  ;;  %v2397_v23 = vld [vmem:[#allocation2 + $0x8] sm:$0xff] }
 0x14d   : > { %v2240_v27 = vsel %vm666_vm3, %v591_v21, -1e+30  ;;  %v2244_v28 = vsel %vm674_vm5, %v599_v22, -1e+30  ;;  %v2248_v29 = vsel %vm2233_vm0, %v599_v22, -1e+30  ;;  %vm2823_vm3 = vcmp.lt.s32.totalorder %v2217_v9, %v2173_v48 }
 0x14e   : > { %2812 = vst [vmem:[#allocation10_spill] sm:$0xff] %v2240_v27  ;;  %2813 = vst [vmem:[#allocation11_spill] sm:$0xff] %v2244_v28  ;;  %v2253_v30 = vsel %vm665_vm4, %v590_v25, -1e+30  ;;  %v1500_v31 = vpop.f32.mrb[2].mxu0  ;;  %715 = vmax.xlane.f32.xlu1 %v2248_v29  ;;  %v1512_v33 = vpop.f32.mrb[2].mxu1 }
 0x14f   : > { %v2257_v32 = vsel %vm673_vm6, %v598_v26, -1e+30  ;;  %v593_v34 = vmul.f32 %v1500_v31, %v589_v17  ;;  %v2262_v35 = vsel %vm2233_vm0, %v591_v21, -1e+30  ;;  %v520_v36 = vpop.f32.mrb[3].mxu0  ;;  %v601_v37 = vmul.f32 %v1512_v33, %v589_v17  ;;  %v560_v38 = vpop.f32.mrb[3].mxu1 }
 0x150   : > { %2814 = vst [vmem:[#allocation12_spill] sm:$0xff] %v2257_v32  ;;  %699 = vmax.xlane.f32.xlu0 %v2262_v35  ;;  %v592_v39 = vmul.f32 %v589_v17, %v520_v36  ;;  %v600_v40 = vmul.f32 %v589_v17, %v560_v38  ;;  %v2292_v46 = vsel %vm2233_vm0, %v590_v25, -1e+30  ;;  %v2312_v59 = vsel %vm2233_vm0, %v598_v26, -1e+30  ;;  %v2395_v21 = vld [vmem:[#allocation2 + $0x48] sm:$0xff] }
 0x151   : > { %v2268_v41 = vsel %vm668_vm7, %v593_v34, -1e+30  ;;  %v2273_v42 = vsel %vm676_vm9, %v601_v37, -1e+30  ;;  %v2277_v43 = vsel %vm2233_vm0, %v593_v34, -1e+30 }
 0x152   : > { %2815 = vst [vmem:[#allocation13_spill] sm:$0xff] %v2268_v41  ;;  %2816 = vst [vmem:[#allocation14_spill] sm:$0xff] %v2273_v42  ;;  %v2282_v44 = vsel %vm667_vm8, %v592_v39, -1e+30  ;;  %703 = vmax.xlane.f32.xlu1 %v2277_v43  ;;  %v2288_v45 = vsel %vm675_vm10, %v600_v40, -1e+30 }
 0x153   : > { %2817 = vst [vmem:[#allocation15_spill] sm:$0xff] %v2282_v44  ;;  %2818 = vst [vmem:[#allocation16_spill] sm:$0xff] %v2288_v45  ;;  %v2296_v47 = vsel %vm2233_vm0, %v601_v37, -1e+30  ;;  %v1503_v49 = vpop.f32.mrb[4].mxu0  ;;  %v1515_v50 = vpop.f32.mrb[4].mxu1 }
 0x154   : > { %697 = vmax.xlane.f32.xlu0 %v2292_v46  ;;  %v595_v51 = vmul.f32 %v1503_v49, %v589_v17  ;;  %v603_v52 = vmul.f32 %v1515_v50, %v589_v17  ;;  %v530_v53 = vpop.f32.mrb[5].mxu0  ;;  %v570_v54 = vpop.f32.mrb[5].mxu1  ;;  %v2327_v6 = vsel %vm2233_vm0, %v592_v39, -1e+30  ;;  %v2331_v4 = vsel %vm2233_vm0, %v600_v40, -1e+30 }
 0x155   : > { %v594_v55 = vmul.f32 %v589_v17, %v530_v53  ;;  %v602_v56 = vmul.f32 %v589_v17, %v570_v54  ;;  %vm1017_vm4 = vcmask 7168   ;;  %v2402_v26 = vld [vmem:[#allocation2 + $0x18] sm:$0xff]  ;;  %v2412_v34 = vld [vmem:[#allocation2] sm:$0xff] }
 0x156   : > { %719 = vmax.xlane.f32.xlu1 %v2296_v47  ;;  %v2303_v57 = vsel %vm670_vm11, %v595_v51, -1e+30  ;;  %v2308_v58 = vsel %vm678_vm12, %v603_v52, -1e+30  ;;  %v1506_v61 = vpop.f32.mrb[6].mxu0  ;;  %v1518_v62 = vpop.f32.mrb[6].mxu1 }
 0x157   : > { %2819 = vst [vmem:[#allocation17_spill] sm:$0xff] %v2303_v57  ;;  %2820 = vst [vmem:[#allocation18_spill] sm:$0xff] %v2308_v58  ;;  %v2317_v60 = vsel %vm669_vm13, %v594_v55, -1e+30  ;;  %v597_v63 = vmul.f32 %v1506_v61, %v589_v17  ;;  %v2323_v0 = vsel %vm677_vm15, %v602_v56, -1e+30  ;;  %v605_v1 = vmul.f32 %v1518_v62, %v589_v17 }
 0x158   : > { %713 = vmax.xlane.f32.xlu0 %v2312_v59  ;;  %2821 = vst [vmem:[#allocation19_spill] sm:$0xff] %v2323_v0  ;;  %v540_v2 = vpop.f32.mrb[7].mxu0  ;;  %v580_v3 = vpop.f32.mrb[7].mxu1  ;;  %v2346_v14 = vsel %vm2233_vm0, %v595_v51, -1e+30  ;;  %v2422_v39 = vld [vmem:[#allocation2 + $0x58] sm:$0xff] }
 0x159   : > { %v596_v7 = vmul.f32 %v589_v17, %v540_v2  ;;  %v604_v10 = vmul.f32 %v589_v17, %v580_v3  ;;  %v2337_v8 = vsel %vm672_vm14, %v597_v63, -1e+30  ;;  %v2342_v11 = vsel %vm2823_vm3, %v605_v1, -1e+30  ;;  %v2431_v51 = vld [vmem:[#allocation2 + $0x40] sm:$0xff] }
 0x15a   : > { %701 = vmax.xlane.f32.xlu1 %v2327_v6  ;;  %2822 = vst [vmem:[#allocation20_spill] sm:$0xff] %v2337_v8  ;;  %2824 = vst [vmem:[#allocation21_spill] sm:$0xff] %v2342_v11  ;;  %v2361_v9 = vsel %vm2233_vm0, %v594_v55, -1e+30  ;;  %v2366_v16 = vsel %vm2233_vm0, %v603_v52, -1e+30 }
 0x15b   : > { %v2351_v15 = vsel %vm671_vm1, %v596_v7, -1e+30  ;;  %v2357_v5 = vsel %vm679_vm2, %v604_v10, -1e+30  ;;  %v2371_v48 = vsel %vm2233_vm0, %v602_v56, -1e+30 }
 0x15c   : > { %2825 = vst [vmem:[#allocation22_spill] sm:$0xff] %v2351_v15  ;;  %717 = vmax.xlane.f32.xlu0 %v2331_v4  ;;  %2826 = vst [vmem:[#allocation23_spill] sm:$0xff] %v2357_v5  ;;  %v2376_v13 = vsel %vm2233_vm0, %v597_v63, -1e+30  ;;  %v2381_v17 = vsel %vm2233_vm0, %v596_v7, -1e+30 }
 0x15d   : > { %v2386_v18 = vsel %vm2233_vm0, %v605_v1, -1e+30  ;;  %v2391_v19 = vsel %vm2233_vm0, %v604_v10, -1e+30  ;;  %v2441_v55 = vld [vmem:[#allocation2 + $0x10] sm:$0xff]  ;;  %v2461_v7 = vld [vmem:[#allocation2 + $0x28] sm:$0xff] }
 0x15e   : > { %707 = vmax.xlane.f32.xlu1 %v2346_v14  ;;  %v2450_v63 = vld [vmem:[#allocation2 + $0x50] sm:$0xff]  ;;  %v2489_v10 = vld [vmem:[#allocation2 + $0x60] sm:$0xff] }
 0x15f   : > { %v2509_v52 = vld [vmem:[#allocation2 + $0x30] sm:$0xff] }
 0x160   : > { %705 = vmax.xlane.f32.xlu0 %v2361_v9  ;;  %v2528_v5 = vld [vmem:[#allocation2 + $0x70] sm:$0xff] }
 0x162   : > { %723 = vmax.xlane.f32.xlu1 %v2366_v16 }
 0x164   : > { %721 = vmax.xlane.f32.xlu0 %v2371_v48 }
 0x166   : > { %711 = vmax.xlane.f32.xlu1 %v2376_v13 }
 0x168   : > { %709 = vmax.xlane.f32.xlu0 %v2381_v17 }
 0x16a   : > { %727 = vmax.xlane.f32.xlu1 %v2386_v18 }
 0x16c   : > { %725 = vmax.xlane.f32.xlu0 %v2391_v19 }
 0x1db   : > { %v716_v22 = vpop.xlane.xlu1 %715 }
 0x1dc   : > { %v2400_v24 = vmax.f32 %v2395_v21, %v716_v22 }
 0x1dd   : > { %v700_v25 = vpop.xlane.xlu0 %699 }
 0x1de   : > { %1043 = vst.msk [vmem:[#allocation2 + $0x48] sm:$0xff] %vm1017_vm4, %v2400_v24  ;;  %v2409_v31 = vmax.f32 %v2397_v23, %v700_v25  ;;  %856 = vperm.xlu0 %1658, %v2400_v24   ;;  %v2470_v25 = vld [vmem:[#allocation2 + $0x20] sm:$0xff] }
 0x1df   : > { %v704_v33 = vpop.xlane.xlu1 %703 }
 0x1e0   : > { %1035 = vst.msk [vmem:[#allocation2 + $0x8] sm:$0xff] %vm1017_vm4, %v2409_v31  ;;  %816 = vperm.xlu1 %1657, %v2409_v31   ;;  %v2420_v37 = vmax.f32 %v2402_v26, %v704_v33 }
 0x1e1   : > { %v698_v38 = vpop.xlane.xlu0 %697 }
 0x1e2   : > { %1037 = vst.msk [vmem:[#allocation2 + $0x18] sm:$0xff] %vm1017_vm4, %v2420_v37  ;;  %v2429_v49 = vmax.f32 %v2412_v34, %v698_v38 }
 0x1e3   : > { %v720_v50 = vpop.xlane.xlu1 %719 }
 0x1e4   : > { %1034 = vst.msk [vmem:[#allocation2] sm:$0xff] %vm1017_vm4, %v2429_v49  ;;  %811 = vperm.xlu0 %1658, %v2429_v49   ;;  %v2439_v53 = vmax.f32 %v2422_v39, %v720_v50  ;;  %v2480_v50 = vld [vmem:[#allocation2 + $0x68] sm:$0xff] }
 0x1e5   : > { %v714_v54 = vpop.xlane.xlu0 %713 }
 0x1e6   : > { %1045 = vst.msk [vmem:[#allocation2 + $0x58] sm:$0xff] %vm1017_vm4, %v2439_v53  ;;  %v2448_v61 = vmax.f32 %v2431_v51, %v714_v54 }
 0x1e7   : > { %v702_v62 = vpop.xlane.xlu1 %701 }
 0x1e8   : > { %1042 = vst.msk [vmem:[#allocation2 + $0x40] sm:$0xff] %vm1017_vm4, %v2448_v61  ;;  %866 = vperm.xlu0 %1658, %v2439_v53   ;;  %851 = vperm.xlu1 %1657, %v2448_v61   ;;  %v2459_v2 = vmax.f32 %v2441_v55, %v702_v62  ;;  %v2499_v62 = vld [vmem:[#allocation2 + $0x38] sm:$0xff] }
 0x1e9   : > { %v718_v3 = vpop.xlane.xlu0 %717 }
 0x1ea   : > { %1036 = vst.msk [vmem:[#allocation2 + $0x10] sm:$0xff] %vm1017_vm4, %v2459_v2  ;;  %v2468_v12 = vmax.f32 %v2450_v63, %v718_v3 }
 0x1eb   : > { %v708_v22 = vpop.xlane.xlu1 %707 }
 0x1ec   : > { %1044 = vst.msk [vmem:[#allocation2 + $0x50] sm:$0xff] %vm1017_vm4, %v2468_v12  ;;  %826 = vperm.xlu1 %1657, %v2420_v37   ;;  %v2478_v38 = vmax.f32 %v2461_v7, %v708_v22 }
 0x1ed   : > { %v706_v54 = vpop.xlane.xlu0 %705 }
 0x1ee   : > { %1039 = vst.msk [vmem:[#allocation2 + $0x28] sm:$0xff] %vm1017_vm4, %v2478_v38  ;;  %v2487_v3 = vmax.f32 %v2470_v25, %v706_v54  ;;  %v2519_v54 = vld [vmem:[#allocation2 + $0x78] sm:$0xff] }
 0x1ef   : > { %v724_v33 = vpop.xlane.xlu1 %723 }
 0x1f0   : > { %821 = vperm.xlu1 %1657, %v2459_v2   ;;  %v2493_v22 = vmax.f32 %v2480_v50, %v724_v33  ;;  %1038 = vst.msk [vmem:[#allocation2 + $0x20] sm:$0xff] %vm1017_vm4, %v2487_v3 }
 0x1f1   : > { %v722_v40 = vpop.xlane.xlu0 %721 }
 0x1f2   : > { %1047 = vst.msk [vmem:[#allocation2 + $0x68] sm:$0xff] %vm1017_vm4, %v2493_v22  ;;  %876 = vperm.xlu0 %1658, %v2493_v22   ;;  %v2507_v33 = vmax.f32 %v2489_v10, %v722_v40 }
 0x1f3   : > { %v712_v1 = vpop.xlane.xlu1 %711 }
 0x1f4   : > { %861 = vperm.xlu1 %1657, %v2468_v12   ;;  %v2513_v56 = vmax.f32 %v2499_v62, %v712_v1  ;;  %1046 = vst.msk [vmem:[#allocation2 + $0x60] sm:$0xff] %vm1017_vm4, %v2507_v33 }
 0x1f5   : > { %v710_v20 = vpop.xlane.xlu0 %709 }
 0x1f6   : > { %1041 = vst.msk [vmem:[#allocation2 + $0x38] sm:$0xff] %vm1017_vm4, %v2513_v56  ;;  %v2526_v11 = vmax.f32 %v2509_v52, %v710_v20 }
 0x1f7   : > { %v728_v1 = vpop.xlane.xlu1 %727 }
 0x1f8   : > { %836 = vperm.xlu1 %1657, %v2478_v38   ;;  %v2532_v36 = vmax.f32 %v2519_v54, %v728_v1  ;;  %1040 = vst.msk [vmem:[#allocation2 + $0x30] sm:$0xff] %vm1017_vm4, %v2526_v11 }
 0x1f9   : > { %v726_v40 = vpop.xlane.xlu0 %725 }
 0x1fa   : > { %1049 = vst.msk [vmem:[#allocation2 + $0x78] sm:$0xff] %vm1017_vm4, %v2532_v36  ;;  %886 = vperm.xlu0 %1658, %v2532_v36   ;;  %v2544_v20 = vmax.f32 %v2528_v5, %v726_v40 }
 0x1fc   : > { %831 = vperm.xlu1 %1657, %v2487_v3   ;;  %1048 = vst.msk [vmem:[#allocation2 + $0x70] sm:$0xff] %vm1017_vm4, %v2544_v20 }
 0x200   : > { %871 = vperm.xlu1 %1657, %v2507_v33  }
 0x204   : > { %846 = vperm.xlu1 %1657, %v2513_v56  }
 0x208   : > { %841 = vperm.xlu1 %1657, %v2526_v11  }
 0x20c   : > { %881 = vperm.xlu1 %1657, %v2544_v20  }
 0x25d   : > { %v857_v0 = vpop.permute.xlu0 %856 }
 0x25e   : > { %v898_v40 = vsub.f32 %v2248_v29, %v857_v0 }
 0x25f   : > { %v817_v58 = vpop.permute.xlu1 %816 }
 0x260   : > { %v890_v42 = vsub.f32 %v2262_v35, %v817_v58  ;;  %v923_v45 = vmul.f32 1.442695, %v898_v40 }
 0x262   : > { %v907_v28 = vmul.f32 1.442695, %v890_v42  ;;  %1659 = vpow2.f32 %v923_v45 }
 0x263   : > { %v812_v1 = vpop.permute.xlu0 %811 }
 0x264   : > { %1661 = vpow2.f32 %v907_v28  ;;  %v889_v32 = vsub.f32 %v2292_v46, %v812_v1 }
 0x266   : > { %v905_v41 = vmul.f32 1.442695, %v889_v32 }
 0x267   : > { %v852_v8 = vpop.permute.xlu1 %851  ;;  %v867_v15 = vpop.permute.xlu0 %866 }
 0x268   : > { %1663 = vpow2.f32 %v905_v41  ;;  %v897_v44 = vsub.f32 %v2312_v59, %v852_v8  ;;  %v900_v57 = vsub.f32 %v2296_v47, %v867_v15 }
 0x26a   : > { %v921_v27 = vmul.f32 1.442695, %v897_v44  ;;  %v927_v28 = vmul.f32 1.442695, %v900_v57 }
 0x26b   : > { %v827_v29 = vpop.permute.xlu1 %826 }
 0x26c   : > { %v1660_v0 = vpop.eup %1659  ;;  %1665 = vpow2.f32 %v921_v27  ;;  %v892_v35 = vsub.f32 %v2277_v43, %v827_v29 }
 0x26d   : > { %987 = vadd.xlane.f32.xlu1 %v1660_v0 }
 0x26e   : > { %v1662_v42 = vpop.eup %1661  ;;  %v911_v45 = vmul.f32 1.442695, %v892_v35 }
 0x26f   : > { %971 = vadd.xlane.f32.xlu0 %v1662_v42  ;;  %v822_v46 = vpop.permute.xlu1 %821 }
 0x270   : > { %1667 = vpow2.f32 %v911_v45  ;;  %v891_v32 = vsub.f32 %v2327_v6, %v822_v46 }
 0x271   : > { %1669 = vpow2.f32 %v927_v28  ;;  %v877_v27 = vpop.permute.xlu0 %876 }
 0x272   : > { %v1664_v41 = vpop.eup %1663  ;;  %v909_v58 = vmul.f32 1.442695, %v891_v32  ;;  %v902_v8 = vsub.f32 %v2366_v16, %v877_v27 }
 0x273   : > { %v862_v44 = vpop.permute.xlu1 %861  ;;  %969 = vadd.xlane.f32.xlu1 %v1664_v41 }
 0x274   : > { %1671 = vpow2.f32 %v909_v58  ;;  %v899_v47 = vsub.f32 %v2331_v4, %v862_v44  ;;  %v931_v40 = vmul.f32 1.442695, %v902_v8 }
 0x276   : > { %v1666_v59 = vpop.eup %1665  ;;  %v925_v43 = vmul.f32 1.442695, %v899_v47 }
 0x277   : > { %985 = vadd.xlane.f32.xlu0 %v1666_v59  ;;  %v837_v57 = vpop.permute.xlu1 %836 }
 0x278   : > { %1673 = vpow2.f32 %v925_v43  ;;  %v894_v15 = vsub.f32 %v2346_v14, %v837_v57 }
 0x279   : > { %v887_v16 = vpop.permute.xlu0 %886 }
 0x27a   : > { %v1668_v1 = vpop.eup %1667  ;;  %v915_v6 = vmul.f32 1.442695, %v894_v15  ;;  %v904_v32 = vsub.f32 %v2386_v18, %v887_v16 }
 0x27b   : > { %v832_v29 = vpop.permute.xlu1 %831  ;;  %975 = vadd.xlane.f32.xlu1 %v1668_v1  ;;  %v1670_v35 = vpop.eup %1669 }
 0x27c   : > { %1675 = vpow2.f32 %v915_v6  ;;  %v893_v0 = vsub.f32 %v2361_v9, %v832_v29  ;;  %v935_v47 = vmul.f32 1.442695, %v904_v32  ;;  %v2827_v29 = vsub.f32 %v2395_v21, %v2400_v24 }
 0x27d   : > { %1677 = vpow2.f32 %v931_v40  ;;  %v2831_v21 = vsub.f32 %v2402_v26, %v2420_v37  ;;  %v937_v37 = vld [vmem:[#allocation3] sm:$0xff] }
 0x27e   : > { %v1672_v4 = vpop.eup %1671  ;;  %v913_v42 = vmul.f32 1.442695, %v893_v0  ;;  %v795_v0 = vmul.f32 1.442695, %v2827_v29  ;;  %v948_v29 = vld [vmem:[#allocation3 + $0x58] sm:$0xff] }
 0x27f   : > { %973 = vadd.xlane.f32.xlu0 %v1672_v4  ;;  %v872_v45 = vpop.permute.xlu1 %871  ;;  %991 = vadd.xlane.f32.xlu1 %v1670_v35  ;;  %v2828_v35 = vsub.f32 %v2397_v23, %v2409_v31  ;;  %v2829_v4 = vsub.f32 %v2412_v34, %v2429_v49  ;;  %v783_v24 = vmul.f32 1.442695, %v2831_v21  ;;  %v938_v31 = vld [vmem:[#allocation3 + $0x8] sm:$0xff]  ;;  %v2833_v49 = vsub.f32 %v2441_v55, %v2459_v2 }
 0x280   : > { %1679 = vpow2.f32 %v913_v42  ;;  %v901_v28 = vsub.f32 %v2371_v48, %v872_v45  ;;  %v2830_v45 = vsub.f32 %v2431_v51, %v2448_v61  ;;  %v2839_v21 = vsub.f32 %v2499_v62, %v2513_v56 }
 0x281   : > { %v777_v42 = vmul.f32 1.442695, %v2829_v4  ;;  %v781_v51 = vmul.f32 1.442695, %v2833_v49 }
 0x282   : > { %v1674_v14 = vpop.eup %1673  ;;  %v929_v46 = vmul.f32 1.442695, %v901_v28  ;;  %v793_v16 = vmul.f32 1.442695, %v2830_v45  ;;  %v947_v45 = vld [vmem:[#allocation3 + $0x50] sm:$0xff] }
 0x283   : > { %989 = vadd.xlane.f32.xlu0 %v1674_v14  ;;  %v847_v41 = vpop.permute.xlu1 %846  ;;  %v946_v14 = vld [vmem:[#allocation3 + $0x48] sm:$0xff] }
 0x284   : > { %1681 = vpow2.f32 %v929_v46  ;;  %v896_v9 = vsub.f32 %v2376_v13, %v847_v41  ;;  %v2832_v46 = vsub.f32 %v2422_v39, %v2439_v53  ;;  %v2834_v39 = vsub.f32 %v2450_v63, %v2468_v12 }
 0x285   : > { %v2836_v63 = vsub.f32 %v2470_v25, %v2487_v3  ;;  %v2838_v25 = vsub.f32 %v2489_v10, %v2507_v33 }
 0x286   : > { %v1676_v58 = vpop.eup %1675  ;;  %v919_v44 = vmul.f32 1.442695, %v896_v9  ;;  %v799_v32 = vmul.f32 1.442695, %v2832_v46  ;;  %v797_v53 = vmul.f32 1.442695, %v2834_v39 }
 0x287   : > { %v842_v27 = vpop.permute.xlu1 %841  ;;  %979 = vadd.xlane.f32.xlu1 %v1676_v58  ;;  %v1678_v43 = vpop.eup %1677  ;;  %v785_v12 = vmul.f32 1.442695, %v2836_v63  ;;  %v801_v3 = vmul.f32 1.442695, %v2838_v25  ;;  %v949_v39 = vld [vmem:[#allocation3 + $0x60] sm:$0xff] }
 0x288   : > { %1683 = vpow2.f32 %v919_v44  ;;  %v895_v59 = vsub.f32 %v2381_v17, %v842_v27  ;;  %v945_v27 = vld [vmem:[#allocation3 + $0x40] sm:$0xff] }
 0x289   : > { %1685 = vpow2.f32 %v935_v47 }
 0x28a   : > { %v1680_v8 = vpop.eup %1679  ;;  %v917_v48 = vmul.f32 1.442695, %v895_v59 }
 0x28b   : > { %977 = vadd.xlane.f32.xlu0 %v1680_v8  ;;  %v882_v57 = vpop.permute.xlu1 %881  ;;  %995 = vadd.xlane.f32.xlu1 %v1678_v43  ;;  %v2835_v43 = vsub.f32 %v2461_v7, %v2478_v38 }
 0x28c   : > { %1687 = vpow2.f32 %v917_v48  ;;  %v903_v18 = vsub.f32 %v2391_v19, %v882_v57  ;;  %v779_v19 = vmul.f32 1.442695, %v2828_v35 }
 0x28d   : > { %v787_v8 = vmul.f32 1.442695, %v2835_v43 }
 0x28e   : > { %v1682_v15 = vpop.eup %1681  ;;  %v933_v13 = vmul.f32 1.442695, %v903_v18 }
 0x28f   : > { %993 = vadd.xlane.f32.xlu0 %v1682_v15  ;;  %v940_v15 = vld [vmem:[#allocation3 + $0x18] sm:$0xff] }
 0x290   : > { %1689 = vpow2.f32 %v933_v13 }
 0x291   : > { %1691 = vpow2.f32 %v795_v0  ;;  %v939_v0 = vld [vmem:[#allocation3 + $0x10] sm:$0xff] }
 0x292   : > { %v1684_v1 = vpop.eup %1683  ;;  %1693 = vpow2.f32 %v779_v19 }
 0x293   : > { %983 = vadd.xlane.f32.xlu1 %v1684_v1  ;;  %v1686_v6 = vpop.eup %1685  ;;  %1695 = vpow2.f32 %v777_v42  ;;  %v2837_v1 = vsub.f32 %v2480_v50, %v2493_v22 }
 0x294   : > { %1697 = vpow2.f32 %v793_v16 }
 0x295   : > { %1699 = vpow2.f32 %v783_v24  ;;  %v791_v24 = vmul.f32 1.442695, %v2839_v21 }
 0x296   : > { %v1688_v40 = vpop.eup %1687  ;;  %1701 = vpow2.f32 %v799_v32 }
 0x297   : > { %981 = vadd.xlane.f32.xlu0 %v1688_v40  ;;  %999 = vadd.xlane.f32.xlu1 %v1686_v6  ;;  %1703 = vpow2.f32 %v781_v51  ;;  %v803_v6 = vmul.f32 1.442695, %v2837_v1 }
 0x298   : > { %1705 = vpow2.f32 %v797_v53 }
 0x299   : > { %1707 = vpow2.f32 %v787_v8 }
 0x29a   : > { %v1690_v17 = vpop.eup %1689  ;;  %1709 = vpow2.f32 %v785_v12 }
 0x29b   : > { %997 = vadd.xlane.f32.xlu0 %v1690_v17  ;;  %v1692_v28 = vpop.eup %1691  ;;  %1711 = vpow2.f32 %v803_v6 }
 0x29c   : > { %v1694_v23 = vpop.eup %1693  ;;  %v962_v34 = vmul.f32 %v1692_v28, %v946_v14  ;;  %1713 = vpow2.f32 %v801_v3 }
 0x29d   : > { %v954_v9 = vmul.f32 %v1694_v23, %v938_v31  ;;  %v1696_v58 = vpop.eup %1695  ;;  %v942_v23 = vld [vmem:[#allocation3 + $0x28] sm:$0xff]  ;;  %v2840_v31 = vsub.f32 %v2509_v52, %v2526_v11  ;;  %1715 = vpow2.f32 %v791_v24  ;;  %v2842_v11 = vsub.f32 %v2528_v5, %v2544_v20  ;;  %v944_v5 = vld [vmem:[#allocation3 + $0x38] sm:$0xff] }
 0x29e   : > { %v953_v47 = vmul.f32 %v1696_v58, %v937_v37  ;;  %v1698_v55 = vpop.eup %1697 }
 0x29f   : > { %v961_v48 = vmul.f32 %v1698_v55, %v945_v27  ;;  %v1700_v57 = vpop.eup %1699  ;;  %v789_v46 = vmul.f32 1.442695, %v2840_v31  ;;  %v805_v52 = vmul.f32 1.442695, %v2842_v11 }
 0x2a0   : > { %v1702_v40 = vpop.eup %1701  ;;  %v956_v7 = vmul.f32 %v1700_v57, %v940_v15  ;;  %v952_v57 = vld [vmem:[#allocation3 + $0x78] sm:$0xff] }
 0x2a1   : > { %v1704_v38 = vpop.eup %1703  ;;  %v964_v19 = vmul.f32 %v1702_v40, %v948_v29  ;;  %1717 = vpow2.f32 %v789_v46  ;;  %v951_v40 = vld [vmem:[#allocation3 + $0x70] sm:$0xff]  ;;  %v1055_v46 = vld [vmem:[#allocation2 + $0x8] sm:$0xff] (!%p1425_p1) }
 0x2a2   : > { %v955_v50 = vmul.f32 %v1704_v38, %v939_v0  ;;  %v1706_v22 = vpop.eup %1705 }
 0x2a3   : > { %v963_v10 = vmul.f32 %v1706_v22, %v947_v45  ;;  %v1708_v33 = vpop.eup %1707 }
 0x2a4   : > { %v1710_v62 = vpop.eup %1709  ;;  %v958_v49 = vmul.f32 %v1708_v33, %v942_v23  ;;  %v1054_v33 = vld [vmem:[#allocation2] sm:$0xff] (!%p1425_p1) }
 0x2a5   : > { %v1712_v51 = vpop.eup %1711 }
 0x2fa   : > { %v988_v61 = vpop.xlane.xlu1 %987 }
 0x2fb   : > { %v1010_v41 = vadd.f32 %v988_v61, %v962_v34  ;;  %v2841_v34 = vsub.f32 %v2519_v54, %v2532_v36  ;;  %v1714_v54 = vpop.eup %1713 }
 0x2fc   : > { %v972_v26 = vpop.xlane.xlu0 %971  ;;  %v965_v55 = vmul.f32 %v1714_v54, %v949_v39 }
 0x2fd   : > { %1027 = vst.msk [vmem:[#allocation3 + $0x48] sm:$0xff] %vm1017_vm4, %v1010_v41  ;;  %v1002_v44 = vadd.f32 %v972_v26, %v954_v9  ;;  %v807_v56 = vmul.f32 1.442695, %v2841_v34  ;;  %v950_v41 = vld [vmem:[#allocation3 + $0x68] sm:$0xff]  ;;  %v941_v9 = vld [vmem:[#allocation3 + $0x20] sm:$0xff] }
 0x2fe   : > { %v966_v26 = vmul.f32 %v1712_v51, %v950_v41  ;;  %v957_v36 = vmul.f32 %v1710_v62, %v941_v9  ;;  %v1056_v62 = vld [vmem:[#allocation2 + $0x10] sm:$0xff] (!%p1425_p1)  ;;  %v1057_v9 = vld [vmem:[#allocation2 + $0x18] sm:$0xff] (!%p1425_p1) }
 0x2ff   : > { %1019 = vst.msk [vmem:[#allocation3 + $0x8] sm:$0xff] %vm1017_vm4, %v1002_v44  ;;  %1719 = vpow2.f32 %v807_v56 }
 0x300   : > { %v970_v2 = vpop.xlane.xlu1 %969  ;;  %1721 = vpow2.f32 %v805_v52 }
 0x301   : > { %v1001_v59 = vadd.f32 %v970_v2, %v953_v47  ;;  %v1716_v2 = vpop.eup %1715 }
 0x302   : > { %v960_v43 = vmul.f32 %v1716_v2, %v944_v5 }
 0x303   : > { %1018 = vst.msk [vmem:[#allocation3] sm:$0xff] %vm1017_vm4, %v1001_v59  ;;  %v1718_v59 = vpop.eup %1717 }
 0x304   : > { %v986_v18 = vpop.xlane.xlu0 %985 }
 0x305   : > { %v1009_v13 = vadd.f32 %v986_v18, %v961_v48  ;;  %v943_v18 = vld [vmem:[#allocation3 + $0x30] sm:$0xff] }
 0x306   : > { %v959_v12 = vmul.f32 %v1718_v59, %v943_v18  ;;  %v1071_v25 = vld [vmem:[#allocation3 + $0x8] sm:$0xff] (!%p1425_p1) }
 0x307   : > { %1026 = vst.msk [vmem:[#allocation3 + $0x40] sm:$0xff] %vm1017_vm4, %v1009_v13 }
 0x308   : > { %v976_v17 = vpop.xlane.xlu1 %975 }
 0x309   : > { %v1004_v35 = vadd.f32 %v976_v17, %v956_v7  ;;  %v1720_v8 = vpop.eup %1719 }
 0x30a   : > { %v968_v63 = vmul.f32 %v1720_v8, %v952_v57  ;;  %v1722_v13 = vpop.eup %1721 }
 0x30b   : > { %1021 = vst.msk [vmem:[#allocation3 + $0x18] sm:$0xff] %vm1017_vm4, %v1004_v35  ;;  %v967_v17 = vmul.f32 %v1722_v13, %v951_v40  ;;  %v1070_v35 = vld [vmem:[#allocation3] sm:$0xff] (!%p1425_p1) }
 0x30c   : > { %v992_v4 = vpop.xlane.xlu1 %991  ;;  %v974_v42 = vpop.xlane.xlu0 %973  ;;  %1723 = vlog2.f32 (!%p1425_p1), %v1070_v35 }
 0x30d   : > { %v1012_v16 = vadd.f32 %v992_v4, %v964_v19  ;;  %v1003_v28 = vadd.f32 %v974_v42, %v955_v50  ;;  %1725 = vlog2.f32 (!%p1425_p1), %v1071_v25  ;;  %v1066_v25 = vld [vmem:[#allocation2 + $0x60] sm:$0xff] (!%p1425_p1) }
 0x30e   : > { %v1078_v45 = vld [vmem:[#allocation3 + $0x40] sm:$0xff] (!%p1425_p1) }
 0x30f   : > { %1029 = vst.msk [vmem:[#allocation3 + $0x58] sm:$0xff] %vm1017_vm4, %v1012_v16  ;;  %1020 = vst.msk [vmem:[#allocation3 + $0x10] sm:$0xff] %vm1017_vm4, %v1003_v28  ;;  %v1079_v16 = vld [vmem:[#allocation3 + $0x48] sm:$0xff] (!%p1425_p1) }
 0x310   : > { %v990_v14 = vpop.xlane.xlu0 %989 }
 0x311   : > { %v1011_v32 = vadd.f32 %v990_v14, %v963_v10 }
 0x312   : > { %v1073_v19 = vld [vmem:[#allocation3 + $0x18] sm:$0xff] (!%p1425_p1) }
 0x313   : > { %1028 = vst.msk [vmem:[#allocation3 + $0x50] sm:$0xff] %vm1017_vm4, %v1011_v32 }
 0x314   : > { %v980_v61 = vpop.xlane.xlu1 %979 }
 0x315   : > { %v1006_v58 = vadd.f32 %v980_v61, %v958_v49 }
 0x316   : > { %v1072_v3 = vld [vmem:[#allocation3 + $0x10] sm:$0xff] (!%p1425_p1)  ;;  %v1081_v21 = vld [vmem:[#allocation3 + $0x58] sm:$0xff] (!%p1425_p1)  ;;  %v1724_v10 = vpop.eup (!%p1425_p1), %1723 }
 0x317   : > { %1023 = vst.msk [vmem:[#allocation3 + $0x28] sm:$0xff] %vm1017_vm4, %v1006_v58  ;;  %1727 = vlog2.f32 (!%p1425_p1), %v1072_v3  ;;  %v1726_v23 = vpop.eup (!%p1425_p1), %1725  ;;  %v1087_v31 = vmul.f32 (!%p1425_p1), 0.6931472, %v1724_v10  ;;  %v1069_v10 = vld [vmem:[#allocation2 + $0x78] sm:$0xff] (!%p1425_p1) }
 0x318   : > { %v996_v37 = vpop.xlane.xlu1 %995  ;;  %v978_v44 = vpop.xlane.xlu0 %977  ;;  %1729 = vlog2.f32 (!%p1425_p1), %v1073_v19  ;;  %v1089_v56 = vmul.f32 (!%p1425_p1), 0.6931472, %v1726_v23 }
 0x319   : > { %v1014_v53 = vadd.f32 %v996_v37, %v966_v26  ;;  %v1005_v47 = vadd.f32 %v978_v44, %v957_v36  ;;  %v1118_v61 = vadd.f32 (!%p1425_p1), %v1087_v31, %v1054_v33  ;;  %v1058_v26 = vld [vmem:[#allocation2 + $0x20] sm:$0xff] (!%p1425_p1)  ;;  %v1059_v44 = vld [vmem:[#allocation2 + $0x28] sm:$0xff] (!%p1425_p1) }
 0x31a   : > { %v1080_v28 = vld [vmem:[#allocation3 + $0x50] sm:$0xff] (!%p1425_p1)  ;;  %v1119_v11 = vadd.f32 (!%p1425_p1), %v1089_v56, %v1055_v46 }
 0x31b   : > { %1031 = vst.msk [vmem:[#allocation3 + $0x68] sm:$0xff] %vm1017_vm4, %v1014_v53  ;;  %1022 = vst.msk [vmem:[#allocation3 + $0x20] sm:$0xff] %vm1017_vm4, %v1005_v47 }
 0x31c   : > { %v994_v27 = vpop.xlane.xlu0 %993  ;;  %1134 = vst.msk [vmem:[%s2011_s7] sm:$0xff] (!%p1425_p1), %vm1017_vm4, %v1118_v61  ;;  %1135 = vst.msk [vmem:[%s2011_s7 + $0x8] sm:$0xff] (!%p1425_p1), %vm1017_vm4, %v1119_v11 }
 0x31d   : > { %v1013_v20 = vadd.f32 %v994_v27, %v965_v55  ;;  %v1060_v55 = vld [vmem:[#allocation2 + $0x30] sm:$0xff] (!%p1425_p1) }
 0x31e   : > { %v1075_v22 = vld [vmem:[#allocation3 + $0x28] sm:$0xff] (!%p1425_p1) }
 0x31f   : > { %1030 = vst.msk [vmem:[#allocation3 + $0x60] sm:$0xff] %vm1017_vm4, %v1013_v20  ;;  %v1061_v20 = vld [vmem:[#allocation2 + $0x38] sm:$0xff] (!%p1425_p1) }
 0x320   : > { %v984_v48 = vpop.xlane.xlu1 %983 }
 0x321   : > { %v1008_v15 = vadd.f32 %v984_v48, %v960_v43  ;;  %v1728_v34 = vpop.eup (!%p1425_p1), %1727  ;;  %v1062_v48 = vld [vmem:[#allocation2 + $0x40] sm:$0xff] (!%p1425_p1) }
 0x322   : > { %v1074_v50 = vld [vmem:[#allocation3 + $0x20] sm:$0xff] (!%p1425_p1)  ;;  %v1083_v14 = vld [vmem:[#allocation3 + $0x68] sm:$0xff] (!%p1425_p1)  ;;  %v1730_v51 = vpop.eup (!%p1425_p1), %1729  ;;  %v1091_v41 = vmul.f32 (!%p1425_p1), 0.6931472, %v1728_v34 }
 0x323   : > { %1025 = vst.msk [vmem:[#allocation3 + $0x38] sm:$0xff] %vm1017_vm4, %v1008_v15  ;;  %1731 = vlog2.f32 (!%p1425_p1), %v1074_v50  ;;  %v1093_v52 = vmul.f32 (!%p1425_p1), 0.6931472, %v1730_v51 }
 0x324   : > { %v1000_v1 = vpop.xlane.xlu1 %999  ;;  %v982_v6 = vpop.xlane.xlu0 %981  ;;  %1733 = vlog2.f32 (!%p1425_p1), %v1075_v22  ;;  %v1120_v54 = vadd.f32 (!%p1425_p1), %v1091_v41, %v1056_v62  ;;  %v1067_v22 = vld [vmem:[#allocation2 + $0x68] sm:$0xff] (!%p1425_p1) }
 0x325   : > { %v1016_v7 = vadd.f32 %v1000_v1, %v968_v63  ;;  %v1007_v38 = vadd.f32 %v982_v6, %v959_v12  ;;  %1053 = sbr.rel (%p1425_p1) target bundleno = 840 (0x348), region = 44  ;;  %v1121_v53 = vadd.f32 (!%p1425_p1), %v1093_v52, %v1057_v9  ;;  %v1063_v63 = vld [vmem:[#allocation2 + $0x48] sm:$0xff] (!%p1425_p1)  ;;  %v1064_v6 = vld [vmem:[#allocation2 + $0x50] sm:$0xff] (!%p1425_p1) }
 0x326   : > { %v1082_v24 = vld [vmem:[#allocation3 + $0x60] sm:$0xff] (!%p1425_p1)  ;;  %1136 = vst.msk [vmem:[%s2011_s7 + $0x10] sm:$0xff] (!%p1425_p1), %vm1017_vm4, %v1120_v54 }
 0x327   : > { %1033 = vst.msk [vmem:[#allocation3 + $0x78] sm:$0xff] %vm1017_vm4, %v1016_v7  ;;  %1024 = vst.msk [vmem:[#allocation3 + $0x30] sm:$0xff] %vm1017_vm4, %v1007_v38 }
 0x328   : > { %v998_v29 = vpop.xlane.xlu0 %997  ;;  %1137 = vst.msk [vmem:[%s2011_s7 + $0x18] sm:$0xff] (!%p1425_p1), %vm1017_vm4, %v1121_v53 }
 0x329   : > { %v1015_v0 = vadd.f32 %v998_v29, %v967_v17  ;;  %v1065_v17 = vld [vmem:[#allocation2 + $0x58] sm:$0xff] (!%p1425_p1) }
 0x32a   : > { %v1077_v42 = vld [vmem:[#allocation3 + $0x38] sm:$0xff] (!%p1425_p1) }
 0x32b   : > { %1032 = vst.msk [vmem:[#allocation3 + $0x70] sm:$0xff] %vm1017_vm4, %v1015_v0 }
 0x32d   : > { %v1732_v58 = vpop.eup %1731 }
 0x32e   : > { %v1076_v4 = vld [vmem:[#allocation3 + $0x30] sm:$0xff]  ;;  %v1085_v49 = vld [vmem:[#allocation3 + $0x78] sm:$0xff]  ;;  %v1734_v36 = vpop.eup %1733  ;;  %v1095_v37 = vmul.f32 0.6931472, %v1732_v58 }
 0x32f   : > { %1735 = vlog2.f32 %v1076_v4  ;;  %v1097_v47 = vmul.f32 0.6931472, %v1734_v36 }
 0x330   : > { %1737 = vlog2.f32 %v1077_v42  ;;  %v1122_v27 = vadd.f32 %v1095_v37, %v1058_v26 }
 0x331   : > { %1739 = vlog2.f32 %v1078_v45  ;;  %v1123_v43 = vadd.f32 %v1097_v47, %v1059_v44 }
 0x332   : > { %1741 = vlog2.f32 %v1079_v16  ;;  %v1084_v32 = vld [vmem:[#allocation3 + $0x70] sm:$0xff]  ;;  %1138 = vst.msk [vmem:[%s2011_s7 + $0x20] sm:$0xff] %vm1017_vm4, %v1122_v27 }
 0x333   : > { %1743 = vlog2.f32 %v1080_v28  ;;  %1139 = vst.msk [vmem:[%s2011_s7 + $0x28] sm:$0xff] %vm1017_vm4, %v1123_v43  ;;  %v1068_v16 = vld [vmem:[#allocation2 + $0x70] sm:$0xff] }
 0x334   : > { %1745 = vlog2.f32 %v1081_v21 }
 0x335   : > { %1747 = vlog2.f32 %v1082_v24 }
 0x336   : > { %1749 = vlog2.f32 %v1083_v14 }
 0x337   : > { %1751 = vlog2.f32 %v1084_v32 }
 0x338   : > { %1753 = vlog2.f32 %v1085_v49 }
 0x339   : > { %v1736_v39 = vpop.eup %1735 }
 0x33a   : > { %v1738_v2 = vpop.eup %1737  ;;  %v1099_v5 = vmul.f32 0.6931472, %v1736_v39 }
 0x33b   : > { %v1740_v59 = vpop.eup %1739  ;;  %v1101_v8 = vmul.f32 0.6931472, %v1738_v2 }
 0x33c   : > { %v1742_v57 = vpop.eup %1741  ;;  %v1124_v18 = vadd.f32 %v1099_v5, %v1060_v55  ;;  %v1103_v15 = vmul.f32 0.6931472, %v1740_v59 }
 0x33d   : > { %v1744_v12 = vpop.eup %1743  ;;  %v1125_v13 = vadd.f32 %v1101_v8, %v1061_v20  ;;  %v1105_v1 = vmul.f32 0.6931472, %v1742_v57 }
 0x33e   : > { %v1746_v40 = vpop.eup %1745  ;;  %1140 = vst.msk [vmem:[%s2011_s7 + $0x30] sm:$0xff] %vm1017_vm4, %v1124_v18  ;;  %v1126_v7 = vadd.f32 %v1103_v15, %v1062_v48  ;;  %v1107_v38 = vmul.f32 0.6931472, %v1744_v12 }
 0x33f   : > { %v1748_v29 = vpop.eup %1747  ;;  %1141 = vst.msk [vmem:[%s2011_s7 + $0x38] sm:$0xff] %vm1017_vm4, %v1125_v13  ;;  %v1127_v0 = vadd.f32 %v1105_v1, %v1063_v63  ;;  %v1109_v35 = vmul.f32 0.6931472, %v1746_v40 }
 0x340   : > { %v1750_v3 = vpop.eup %1749  ;;  %1142 = vst.msk [vmem:[%s2011_s7 + $0x40] sm:$0xff] %vm1017_vm4, %v1126_v7  ;;  %v1128_v19 = vadd.f32 %v1107_v38, %v1064_v6  ;;  %v1111_v50 = vmul.f32 0.6931472, %v1748_v29 }
 0x341   : > { %v1752_v4 = vpop.eup %1751  ;;  %1143 = vst.msk [vmem:[%s2011_s7 + $0x48] sm:$0xff] %vm1017_vm4, %v1127_v0  ;;  %v1129_v42 = vadd.f32 %v1109_v35, %v1065_v17  ;;  %v1113_v45 = vmul.f32 0.6931472, %v1750_v3 }
 0x342   : > { %v1754_v28 = vpop.eup %1753  ;;  %1144 = vst.msk [vmem:[%s2011_s7 + $0x50] sm:$0xff] %vm1017_vm4, %v1128_v19  ;;  %v1130_v21 = vadd.f32 %v1111_v50, %v1066_v25  ;;  %v1115_v24 = vmul.f32 0.6931472, %v1752_v4 }
 0x343   : > { %1145 = vst.msk [vmem:[%s2011_s7 + $0x58] sm:$0xff] %vm1017_vm4, %v1129_v42  ;;  %v1131_v33 = vadd.f32 %v1113_v45, %v1067_v22  ;;  %v1117_v14 = vmul.f32 0.6931472, %v1754_v28 }
 0x344   : > { %1146 = vst.msk [vmem:[%s2011_s7 + $0x60] sm:$0xff] %vm1017_vm4, %v1130_v21  ;;  %v1132_v23 = vadd.f32 %v1115_v24, %v1068_v16 }
 0x345   : > { %1147 = vst.msk [vmem:[%s2011_s7 + $0x68] sm:$0xff] %vm1017_vm4, %v1131_v33  ;;  %v1133_v31 = vadd.f32 %v1117_v14, %v1069_v10 }
 0x346   : > { %1148 = vst.msk [vmem:[%s2011_s7 + $0x70] sm:$0xff] %vm1017_vm4, %v1132_v23 }
 0x347   : > { %1149 = vst.msk [vmem:[%s2011_s7 + $0x78] sm:$0xff] %vm1017_vm4, %v1133_v31 }
 0x348 PF: > { %v1150_v46 = vmax.f32 %v2253_v30, %v2317_v60  ;;  %v2843_v32 = vld [vmem:[#allocation17_spill] sm:$0xff]  ;;  %v2844_v34 = vld [vmem:[#allocation10_spill] sm:$0xff]  ;;  %v2846_v49 = vld [vmem:[#allocation15_spill] sm:$0xff]  ;;  %s1427_s19 = sshll.u32 %s1871_s26, 1  ;;  %s1269_s1 = sshll.u32 %s258_s6, 4  ;;  %s2728_s1 = int_to_ptr.vmem [resolvable:$true] %s1269_s1 }
 0x349   : > { %v1151_v56 = vmax.f32 %v2844_v34, %v2843_v32  ;;  %v2845_v62 = vld [vmem:[#allocation22_spill] sm:$0xff]  ;;  %v2847_v61 = vld [vmem:[#allocation20_spill] sm:$0xff]  ;;  %v2848_v41 = vld [vmem:[#allocation13_spill] sm:$0xff]  ;;  %s1265_s20 = sadd.s32 %s1867_s25, %s1427_s19  ;;  %s2857_s25 = sand.u32 1, %s1859_s23  }
 0x34a   : > { %v1152_v51 = vmax.f32 %v2846_v49, %v2845_v62  ;;  %v1153_v9 = vmax.f32 %v2848_v41, %v2847_v61  ;;  %v2849_v58 = vld [vmem:[#allocation12_spill] sm:$0xff]  ;;  %v2850_v52 = vld [vmem:[#allocation11_spill] sm:$0xff]  ;;  %v2852_v37 = vld [vmem:[#allocation14_spill] sm:$0xff]  ;;  %s1428_s21 = sshll.u32 %s1265_s20, 7  ;;  %s1250_s26 = scalar_lea.sflag [#allocation7], %s2857_s25 }
 0x34b   : > { %v1154_v11 = vmax.f32 %v1150_v46, %v2849_v58  ;;  %v1155_v26 = vmax.f32 %v1151_v56, %v2850_v52  ;;  %v2851_v36 = vld [vmem:[#allocation16_spill] sm:$0xff]  ;;  %v2853_v39 = vld [vmem:[#allocation19_spill] sm:$0xff]  ;;  %v2854_v47 = vld [vmem:[#allocation18_spill] sm:$0xff]  ;;  %s2726_s10 = scalar_lea.hbm %s2788_s5, %s1428_s21  ;;  %s1789_s11 = scalar_lea.vmem %s2728_s1, 128 }
 0x34c   : > { %v1156_v54 = vmax.f32 %v1152_v51, %v2851_v36  ;;  %v1157_v44 = vmax.f32 %v1153_v9, %v2852_v37  ;;  %v2855_v2 = vld [vmem:[#allocation23_spill] sm:$0xff]  ;;  %v2856_v5 = vld [vmem:[#allocation21_spill] sm:$0xff]  ;;  %p1790_p2 = scmp.ne.s32.totalorder %s2728_s1, %s1789_s11  ;;  %s1888_s12 = smov [#allocation6]  }
 0x34d   : > { %v1158_v53 = vmax.f32 %v1154_v11, %v2853_v39  ;;  %v1159_v55 = vmax.f32 %v1155_v26, %v2854_v47  ;;  %s1793_s14 = sshll.u32 %s1888_s12, 4  ;;  %s1794_s14 = int_to_ptr.vmem [resolvable:$false] %s1793_s14 }
 0x34e   : > { %v1160_v27 = vmax.f32 %v1156_v54, %v2855_v2  ;;  %v1161_v20 = vmax.f32 %v1157_v44, %v2856_v5  ;;  %p1791_p4 = pnand %p1790_p2, %p1976_p3  ;;  %s1795_s15 = scalar_lea.vmem %s1794_s14, 256 }
 0x34f   : > { %v1162_v59 = vmax.f32 %v1158_v53, %v1159_v55  ;;  %p1796_p6 = scmp.lt.s32.totalorder %s2728_s1, %s1794_s14  ;;  %p1797_p7 = scmp.lt.s32.totalorder %s1795_s15, %s1789_s11 }
 0x350   : > { %v1163_v43 = vmax.f32 %v1160_v27, %v1161_v20  ;;  %p1792_p5 = pneg %p1791_p4 }
 0x351   : > { %p1798_p9 = por %p1797_p7, %p1796_p6 }
 0x352   : > { %v1164_v8 = vmax.f32 %v1162_v59, %v1163_v43 }
 0x353   : > { %p1799_p10 = pnand %p1798_p9, %p1792_p5 }
 0x354   : > { %v1165_v48 = vrot.slane %v1164_v8, 4 }
 0x356   : > { %v1166_v57 = vmax.f32 %v1164_v8, %v1165_v48 }
 0x358   : > { %v1167_v18 = vrot.slane %v1166_v57, 2 }
 0x35a   : > { %v1168_v15 = vmax.f32 %v1166_v57, %v1167_v18 }
 0x35c   : > { %v1169_v63 = vrot.slane %v1168_v15, 1 }
 0x35e   : > { %v2684_v12 = vmax.f32 %v1168_v15, %v1169_v63 }
 0x360   : > { %v1171_v13 = vsub.f32 %v2253_v30, %v2684_v12  ;;  %v1172_v1 = vsub.f32 %v2844_v34, %v2684_v12  ;;  %v1173_v6 = vsub.f32 %v2846_v49, %v2684_v12  ;;  %v1174_v40 = vsub.f32 %v2848_v41, %v2684_v12 }
 0x361   : > { %v1175_v7 = vsub.f32 %v2317_v60, %v2684_v12  ;;  %v1176_v0 = vsub.f32 %v2843_v32, %v2684_v12  ;;  %v1177_v30 = vsub.f32 %v2845_v62, %v2684_v12  ;;  %v1178_v3 = vsub.f32 %v2847_v61, %v2684_v12 }
 0x362   : > { %v1187_v38 = vmul.f32 1.442695, %v1171_v13  ;;  %v1189_v17 = vmul.f32 1.442695, %v1172_v1  ;;  %v1191_v29 = vmul.f32 1.442695, %v1173_v6  ;;  %v1179_v60 = vsub.f32 %v2849_v58, %v2684_v12 }
 0x363   : > { %v1193_v35 = vmul.f32 1.442695, %v1174_v40  ;;  %v1195_v25 = vmul.f32 1.442695, %v1175_v7  ;;  %v1197_v19 = vmul.f32 1.442695, %v1176_v0  ;;  %v1180_v22 = vsub.f32 %v2850_v52, %v2684_v12 }
 0x364   : > { %1755 = vpow2.f32 %v1187_v38  ;;  %v1199_v50 = vmul.f32 1.442695, %v1177_v30  ;;  %v1201_v4 = vmul.f32 1.442695, %v1178_v3  ;;  %v1181_v42 = vsub.f32 %v2851_v36, %v2684_v12 }
 0x365   : > { %1757 = vpow2.f32 %v1189_v17  ;;  %v1203_v45 = vmul.f32 1.442695, %v1179_v60  ;;  %v1182_v21 = vsub.f32 %v2852_v37, %v2684_v12  ;;  %v1205_v24 = vmul.f32 1.442695, %v1180_v22 }
 0x366   : > { %1759 = vpow2.f32 %v1191_v29  ;;  %v1183_v23 = vsub.f32 %v2853_v39, %v2684_v12  ;;  %v1207_v31 = vmul.f32 1.442695, %v1181_v42  ;;  %v1184_v34 = vsub.f32 %v2854_v47, %v2684_v12 }
 0x367   : > { %1761 = vpow2.f32 %v1193_v35  ;;  %v1209_v56 = vmul.f32 1.442695, %v1182_v21  ;;  %v1185_v51 = vsub.f32 %v2855_v2, %v2684_v12  ;;  %v1186_v58 = vsub.f32 %v2856_v5, %v2684_v12 }
 0x368   : > { %1763 = vpow2.f32 %v1195_v25  ;;  %v1211_v61 = vmul.f32 1.442695, %v1183_v23  ;;  %v1213_v11 = vmul.f32 1.442695, %v1184_v34 }
 0x369   : > { %1765 = vpow2.f32 %v1197_v19  ;;  %v1215_v36 = vmul.f32 1.442695, %v1185_v51  ;;  %v1217_v44 = vmul.f32 1.442695, %v1186_v58 }
 0x36a   : > { %1767 = vpow2.f32 %v1199_v50 }
 0x36b   : > { %1769 = vpow2.f32 %v1201_v4 }
 0x36c   : > { %1771 = vpow2.f32 %v1203_v45 }
 0x36d   : > { %1773 = vpow2.f32 %v1205_v24 }
 0x36e   : > { %v1756_v16 = vpop.eup %1755  ;;  %1775 = vpow2.f32 %v1207_v31 }
 0x36f   : > { %v1758_v28 = vpop.eup %1757  ;;  %1777 = vpow2.f32 %v1209_v56 }
 0x370   : > { %v1760_v10 = vpop.eup %1759  ;;  %v1219_v33 = vadd.f32 %v1758_v28, %v1756_v16  ;;  %1779 = vpow2.f32 %v1211_v61 }
 0x371   : > { %v1762_v14 = vpop.eup %1761  ;;  %1781 = vpow2.f32 %v1213_v11 }
 0x372   : > { %v1220_v46 = vadd.f32 %v1760_v10, %v1219_v33  ;;  %v1764_v32 = vpop.eup %1763  ;;  %1783 = vpow2.f32 %v1215_v36 }
 0x373   : > { %v1766_v49 = vpop.eup %1765  ;;  %1785 = vpow2.f32 %v1217_v44 }
 0x374   : > { %v1221_v62 = vadd.f32 %v1762_v14, %v1220_v46  ;;  %v1768_v9 = vpop.eup %1767 }
 0x375   : > { %v1770_v26 = vpop.eup %1769 }
 0x376   : > { %v1222_v41 = vadd.f32 %v1764_v32, %v1221_v62  ;;  %v1772_v37 = vpop.eup %1771 }
 0x377   : > { %v1774_v53 = vpop.eup %1773 }
 0x378   : > { %v1223_v52 = vadd.f32 %v1766_v49, %v1222_v41  ;;  %v1776_v55 = vpop.eup %1775 }
 0x379   : > { %v1778_v27 = vpop.eup %1777 }
 0x37a   : > { %v1224_v54 = vadd.f32 %v1768_v9, %v1223_v52  ;;  %v1780_v5 = vpop.eup %1779 }
 0x37b   : > { %v1782_v43 = vpop.eup %1781 }
 0x37c   : > { %v1225_v39 = vadd.f32 %v1770_v26, %v1224_v54  ;;  %v1784_v48 = vpop.eup %1783 }
 0x37d   : > { %v1786_v18 = vpop.eup %1785 }
 0x37e   : > { %v1226_v47 = vadd.f32 %v1772_v37, %v1225_v39 }
 0x380   : > { %v1227_v2 = vadd.f32 %v1774_v53, %v1226_v47 }
 0x382   : > { %v1228_v20 = vadd.f32 %v1776_v55, %v1227_v2 }
 0x384   : > { %v1229_v59 = vadd.f32 %v1778_v27, %v1228_v20 }
 0x386   : > { %v1230_v8 = vadd.f32 %v1780_v5, %v1229_v59 }
 0x388   : > { %v1231_v57 = vadd.f32 %v1782_v43, %v1230_v8 }
 0x38a   : > { %v1232_v15 = vadd.f32 %v1784_v48, %v1231_v57 }
 0x38c   : > { %v1233_v63 = vadd.f32 %v1786_v18, %v1232_v15 }
 0x38e   : > { %v1234_v13 = vrot.slane %v1233_v63, 4 }
 0x390   : > { %v1235_v1 = vadd.f32 %v1234_v13, %v1233_v63 }
 0x392   : > { %v1236_v6 = vrot.slane %v1235_v1, 2 }
 0x394   : > { %v1237_v40 = vadd.f32 %v1236_v6, %v1235_v1 }
 0x396   : > { %v1238_v7 = vrot.slane %v1237_v40, 1 }
 0x398   : > { %v1239_v38 = vadd.f32 %v1238_v7, %v1237_v40 }
 0x39a   : > { %1787 = vlog2.f32 %v1239_v38 }
 0x3a4   : > { %v1788_v17 = vpop.eup %1787 }
 0x3a5   : > { %v1241_v29 = vmul.f32 0.6931472, %v1788_v17 }
 0x3a7   : > { %v1242_v0 = vadd.f32 %v1241_v29, %v2684_v12 }
 0x3a9   : > { %1243 = vst [vmem:[%s258_s6] sm:$0xff] %v1242_v0 }
 0x3aa   : > { %1802 = shalt.err (!%p1799_p10)
}
 0x3ab   : > { %s1803_s6 = scalar_lea.hbm %s2726_s10, 128  ;;  %s1807_s18 = scalar_lea.hbm %s2788_s5, 512 }
 0x3ac   : > { %p1804_p11 = scmp.ne.s32.totalorder %s2726_s10, %s1803_s6  ;;  %p1808_p0 = scmp.lt.u32.totalorder %s2726_s10, %s2788_s5 }
 0x3ad   : > { %p1809_p1 = scmp.lt.u32.totalorder %s1807_s18, %s1803_s6  ;;  %p1811_p4 = scmp.lt.u32.totalorder %s1803_s6, %s2726_s10 }
 0x3ae   : > { %p1805_p12 = pnand %p1804_p11, %p1976_p3 }
 0x3af   : > { %p1810_p2 = por %p1809_p1, %p1808_p0 }
 0x3b0   : > { %p1806_p13 = pneg %p1805_p12 }
 0x3b1   : > { %p1812_p5 = por %p1811_p4, %p1810_p2 }
 0x3b3   : > { %p1813_p6 = pnand %p1812_p5, %p1806_p13 }
 0x3b5   : > { %1816 = shalt.err (!%p1813_p6)
}
 0x3b6   : > { %1583 = dma.vmem_to_hbm [thread:$0]  (%p1976_p3), %s2728_s1, 128, %s2726_s10, %s1250_s26  }
 0x3b7 PF: > { %p1589_p7 = scmp.ge.s32.totalorder %s1883_s0, 2  ;;  %s1289_s21 = sand.u32 1, %s1855_s22  }
 0x3b8   : > { %s1290_s29 = scalar_lea.sflag [#allocation7], %s1289_s21 }
 0x3b9   : > { %p1586_p9 = pnand %p1589_p7, %p1985_p8 }
 0x3bb   : > { %1850 = dma.done.wait (!%p1586_p9), %s1290_s29, 128  }
 0x3bc   : > { %1852 = vsyncadd (!%p1586_p9), %s1290_s29, 4294967168  ;;  %s21_s0 = sadd.s32 1, %s1883_s0   ;;  %s2858_s8 = sld [smem:[#allocation9_spill]] }
 0x3bd   : > { %p18_p10 = scmp.ge.s32.totalorder %s21_s0, 6   ;;  %s2859_s22 = smov %s1859_s23 }
 0x3be   : > { %s2860_s23 = smov %s1863_s24  ;;  %s2861_s24 = smov %s1994_s13 }
 0x3bf   : > { %s2862_s25 = smov %s1875_s27  ;;  %s2863_s26 = smov %s1879_s28 }
 0x3c0   : > { %s2864_s27 = smov %s2867_s30  ;;  %20 = sbr.rel (!%p18_p10) target bundleno = 8 (0x8), region = 94 }
 0x3c2   : > { %s2865_s28 = smov %s2858_s8 }
 0x3c7   :  { %1295 = vsyncpa [#allocation7], 1 }
 0x3c8   :  { %1297 = vsyncpa [#allocation7 + $0x1], 1 }

</bundles_post_ra>
